<compile_context>
chip_gen: v7x
topology: tpu7x:2x2x1
jax: 0.10.0
libtpu: 0.0.40
codegen_flags: <defaults>
</compile_context>

<pallas_src>
import functools

import jax
import jax.numpy as jnp
from jax import lax
from jax.experimental import pallas as pl
from jax.experimental.pallas import tpu as pltpu


def _resblock_kernel(x_ref, mask_ref, w1_ref, b1_ref, w2_ref, b2_ref, o_ref, *,
                     H, W, C, K, lanes, res_scale, mxu_dtype):
    """One batch_tile-image slab per grid step.

    x_ref   : (C, lanes)       lanes = batch_tile * H * W (image-major lanes)
    mask_ref: (K*K, 1, lanes)  precomputed {0,1} 'same'-padding boundary masks
    w*_ref  : (C, K*K*C)       conv weights (tap-major, in-channel-minor), MXU dtype
    b*_ref  : (C, 1)           biases, f32
    o_ref   : (C, lanes)       output
    """
    pad = K // 2                       # matches PyTorch default_conv pad = K // 2
    center = pad * K + pad

    # Static lane-roll shift per tap so that out[p] = in[p + oy*W + ox].
    shifts = [(-((dy - pad) * W + (dx - pad))) % lanes
              for dy in range(K) for dx in range(K)]

    x_f32 = x_ref[...].astype(jnp.float32)          # residual + conv1 source

    def conv(inp, w_ref, b_ref):
        # inp: (C, lanes) f32.  Build the (K*K*C, lanes) im2col patch with XLU
        # lane rolls + precomputed boundary masks (masked positions also cover
        # the circular wrap across image boundaries inside the slab), cast the
        # taps to the MXU dtype, then one MXU matmul with contraction K*K*C.
        cols = []
        for t, shift in enumerate(shifts):
            v = pltpu.roll(inp, shift, 1) if shift else inp
            if t != center:                          # center tap needs no mask
                v = v * mask_ref[t]                  # (1, lanes) bcast over C
            cols.append(v.astype(mxu_dtype))
        patch = jnp.concatenate(cols, axis=0)        # (K*K*C, lanes)
        acc = jnp.dot(w_ref[...], patch,
                      preferred_element_type=jnp.float32)   # (C, lanes) f32
        return acc + b_ref[...]                      # bias bcast over lanes

    h = jnp.maximum(conv(x_f32, w1_ref, b1_ref), 0.0)        # conv1 + ReLU (f32)
    y = conv(h, w2_ref, b2_ref)                               # conv2 (f32 accum)
    o_ref[...] = (y * jnp.float32(res_scale) + x_f32).astype(o_ref.dtype)


def _boundary_masks(H, W, K):
    """(K*K, H*W) {0,1} f32 masks for 'same' padding, one row per tap."""
    pad = K // 2
    HW = H * W
    yy = jnp.arange(HW, dtype=jnp.int32) // W
    xx = jnp.arange(HW, dtype=jnp.int32) % W
    rows = []
    for dy in range(K):
        for dx in range(K):
            oy, ox = dy - pad, dx - pad
            m = ((yy + oy >= 0) & (yy + oy < H) &
                 (xx + ox >= 0) & (xx + ox < W))
            rows.append(m)
    return jnp.stack(rows).astype(jnp.float32)


def _pick_batch_tile(N, HW, max_lanes=4096):
    """Widest batch fold that (a) keeps >=2 grid steps when N>=2 (v7x dual TC)
    and (b) keeps the lane width modest."""
    divs = [d for d in range(1, N + 1) if N % d == 0 and d * HW <= max_lanes]
    if not divs:
        return 1
    multi = [d for d in divs if N // d >= 2]
    return max(multi) if multi else max(divs)


def resblock_pallas(x, w1, b1, w2, b2, *, res_scale=1.0,
                    mxu_dtype=jnp.bfloat16, batch_tile=None):
    """x: (N, C, H, W) NCHW; w: (C, C, K, K) OIHW; b: (C,)."""
    N, C, H, W = x.shape
    K = w1.shape[-1]
    HW = H * W
    if batch_tile is None:
        batch_tile = _pick_batch_tile(N, HW)
    assert N % batch_tile == 0
    grid = N // batch_tile
    lanes = batch_tile * HW

    # Layout plumbing (wrapper side): channels -> sublanes, (batch, spatial)
    # -> lanes, so the kernel's matmul output and stores are lane-dense.
    x2 = jnp.transpose(x.reshape(N, C, HW), (1, 0, 2)).reshape(C, N * HW)

    # Weight matrix Wm[co, (dy*K + dx)*C + ci] = w[co, ci, dy, dx], matching the
    # tap-major / ci-minor im2col patch ordering; cast once to the MXU dtype.
    w1m = jnp.transpose(w1, (0, 2, 3, 1)).reshape(C, K * K * C).astype(mxu_dtype)
    w2m = jnp.transpose(w2, (0, 2, 3, 1)).reshape(C, K * K * C).astype(mxu_dtype)
    b1c = b1.reshape(C, 1).astype(jnp.float32)
    b2c = b2.reshape(C, 1).astype(jnp.float32)

    # Precomputed boundary masks, tiled per image in the slab: (K*K, 1, lanes).
    mask = jnp.tile(_boundary_masks(H, W, K), (1, batch_tile))
    mask = mask.reshape(K * K, 1, lanes)

    kernel = functools.partial(_resblock_kernel, H=H, W=W, C=C, K=K,
                               lanes=lanes, res_scale=float(res_scale),
                               mxu_dtype=mxu_dtype)

    out2 = pl.pallas_call(
        kernel,
        out_shape=jax.ShapeDtypeStruct((C, N * HW), x.dtype),
        grid_spec=pltpu.PrefetchScalarGridSpec(
            num_scalar_prefetch=0,
            grid=(grid,),
            in_specs=[
                pl.BlockSpec((C, lanes), lambda n: (0, n)),
                pl.BlockSpec((K * K, 1, lanes), lambda n: (0, 0, 0)),
                pl.BlockSpec((C, K * K * C), lambda n: (0, 0)),
                pl.BlockSpec((C, 1), lambda n: (0, 0)),
                pl.BlockSpec((C, K * K * C), lambda n: (0, 0)),
                pl.BlockSpec((C, 1), lambda n: (0, 0)),
            ],
            out_specs=pl.BlockSpec((C, lanes), lambda n: (0, n)),
        ),
        compiler_params=pltpu.CompilerParams(
            dimension_semantics=("parallel",)),
    )(x2, mask, w1m, b1c, w2m, b2c)

    return jnp.transpose(out2.reshape(C, N, HW), (1, 0, 2)).reshape(N, C, H, W)


def resblock_ref(x, w1, b1, w2, b2, *, res_scale=1.0):
    """Pure-JAX reference (matches the PyTorch ResBlock forward, NCHW/OIHW)."""
    dn = lax.conv_dimension_numbers(x.shape, w1.shape, ("NCHW", "OIHW", "NCHW"))
    y = lax.conv_general_dilated(x, w1, (1, 1), "SAME",
                                 dimension_numbers=dn) + b1.reshape(1, -1, 1, 1)
    y = jnp.maximum(y, 0.0)
    y = lax.conv_general_dilated(y, w2, (1, 1), "SAME",
                                 dimension_numbers=dn) + b2.reshape(1, -1, 1, 1)
    return y * res_scale + x


if __name__ == "__main__":
    # Module config: n_feats=16, kernel_size=3, bias=True, bn=False, act=ReLU,
    # res_scale=1.  N=4 so the batch fold (batch_tile=2) still leaves 2 grid
    # steps for v7x's two TensorCores.
    N, C, H, W, K = 4, 16, 16, 16, 3
    res_scale = 1.0

    key = jax.random.PRNGKey(0)
    kx, kw1, kb1, kw2, kb2 = jax.random.split(key, 5)

    x = jax.random.normal(kx, (N, C, H, W), dtype=jnp.float32)
    w1 = jax.random.normal(kw1, (C, C, K, K), dtype=jnp.float32) * 0.05
    b1 = jax.random.normal(kb1, (C,), dtype=jnp.float32) * 0.05
    w2 = jax.random.normal(kw2, (C, C, K, K), dtype=jnp.float32) * 0.05
    b2 = jax.random.normal(kb2, (C,), dtype=jnp.float32) * 0.05

    ref = resblock_ref(x, w1, b1, w2, b2, res_scale=res_scale)

    # Structural correctness check: f32 MXU path must match the f32 reference.
    out_f32 = jax.block_until_ready(
        resblock_pallas(x, w1, b1, w2, b2, res_scale=res_scale,
                        mxu_dtype=jnp.float32))
    assert out_f32.shape == (N, C, H, W)
    err_f32 = jnp.max(jnp.abs(out_f32 - ref))
    assert err_f32 < 1e-4, f"f32 path mismatch vs reference: {err_f32}"

    # Performance path: bf16 MXU operands, f32 accumulation (default config).
    out_bf16 = jax.block_until_ready(
        resblock_pallas(x, w1, b1, w2, b2, res_scale=res_scale))
    err_bf16 = jnp.max(jnp.abs(out_bf16 - ref))
    assert err_bf16 < 5e-2, f"bf16 path mismatch vs reference: {err_bf16}"

    print("KERNEL_OK")
</pallas_src>

<mosaic_0001>
module attributes {stable_mosaic.version = 11 : i64} {
  func.func @_resblock_kernel(%arg0: i32, %arg1: memref<16x512xf32, #tpu.memory_space<vmem>>, %arg2: memref<9x1x512xf32, #tpu.memory_space<vmem>>, %arg3: memref<16x144xf32, #tpu.memory_space<vmem>>, %arg4: memref<16x1xf32, #tpu.memory_space<vmem>>, %arg5: memref<16x144xf32, #tpu.memory_space<vmem>>, %arg6: memref<16x1xf32, #tpu.memory_space<vmem>>, %arg7: memref<16x512xf32, #tpu.memory_space<vmem>>) attributes {dimension_semantics = [#tpu.dimension_semantics<parallel>], iteration_bounds = array<i64: 2>, scalar_prefetch = 0 : i64, scratch_operands = 0 : i64, tpu.core_type = #tpu.core_type<tc>, window_params = [{transform_indices = @transform_0, window_bounds = array<i64: 16, 512>}, {pipeline_mode = #tpu.pipeline_mode<synchronous>, transform_indices = @transform_1, window_bounds = array<i64: 9, 1, 512>}, {pipeline_mode = #tpu.pipeline_mode<synchronous>, transform_indices = @transform_2, window_bounds = array<i64: 16, 144>}, {pipeline_mode = #tpu.pipeline_mode<synchronous>, transform_indices = @transform_3, window_bounds = array<i64: 16, 1>}, {pipeline_mode = #tpu.pipeline_mode<synchronous>, transform_indices = @transform_4, window_bounds = array<i64: 16, 144>}, {pipeline_mode = #tpu.pipeline_mode<synchronous>, transform_indices = @transform_5, window_bounds = array<i64: 16, 1>}, {transform_indices = @transform_6, window_bounds = array<i64: 16, 512>}]} {
    %c0 = arith.constant 0 : index
    %c0_0 = arith.constant 0 : index
    %0 = vector.load %arg1[%c0, %c0_0] : memref<16x512xf32, #tpu.memory_space<vmem>>, vector<16x512xf32>
    %c17_i32 = arith.constant 17 : i32
    %1 = tpu.dynamic_rotate %0 by %c17_i32 dim 1 : vector<16x512xf32>, i32 -> vector<16x512xf32>
    %c0_1 = arith.constant 0 : index
    %c0_2 = arith.constant 0 : index
    %c0_3 = arith.constant 0 : index
    %2 = vector.load %arg2[%c0_1, %c0_2, %c0_3] : memref<9x1x512xf32, #tpu.memory_space<vmem>>, vector<1x1x512xf32>
    %3 = vector.shape_cast %2 : vector<1x1x512xf32> to vector<1x512xf32>
    %4 = vector.broadcast %3 : vector<1x512xf32> to vector<16x512xf32>
    %5 = arith.mulf %1, %4 : vector<16x512xf32>
    %c16_i32 = arith.constant 16 : i32
    %6 = tpu.dynamic_rotate %0 by %c16_i32 dim 1 : vector<16x512xf32>, i32 -> vector<16x512xf32>
    %c1 = arith.constant 1 : index
    %c0_4 = arith.constant 0 : index
    %c0_5 = arith.constant 0 : index
    %7 = vector.load %arg2[%c1, %c0_4, %c0_5] : memref<9x1x512xf32, #tpu.memory_space<vmem>>, vector<1x1x512xf32>
    %8 = vector.shape_cast %7 : vector<1x1x512xf32> to vector<1x512xf32>
    %9 = vector.broadcast %8 : vector<1x512xf32> to vector<16x512xf32>
    %10 = arith.mulf %6, %9 : vector<16x512xf32>
    %c15_i32 = arith.constant 15 : i32
    %11 = tpu.dynamic_rotate %0 by %c15_i32 dim 1 : vector<16x512xf32>, i32 -> vector<16x512xf32>
    %c2 = arith.constant 2 : index
    %c0_6 = arith.constant 0 : index
    %c0_7 = arith.constant 0 : index
    %12 = vector.load %arg2[%c2, %c0_6, %c0_7] : memref<9x1x512xf32, #tpu.memory_space<vmem>>, vector<1x1x512xf32>
    %13 = vector.shape_cast %12 : vector<1x1x512xf32> to vector<1x512xf32>
    %14 = vector.broadcast %13 : vector<1x512xf32> to vector<16x512xf32>
    %15 = arith.mulf %11, %14 : vector<16x512xf32>
    %c1_i32 = arith.constant 1 : i32
    %16 = tpu.dynamic_rotate %0 by %c1_i32 dim 1 : vector<16x512xf32>, i32 -> vector<16x512xf32>
    %c3 = arith.constant 3 : index
    %c0_8 = arith.constant 0 : index
    %c0_9 = arith.constant 0 : index
    %17 = vector.load %arg2[%c3, %c0_8, %c0_9] : memref<9x1x512xf32, #tpu.memory_space<vmem>>, vector<1x1x512xf32>
    %18 = vector.shape_cast %17 : vector<1x1x512xf32> to vector<1x512xf32>
    %19 = vector.broadcast %18 : vector<1x512xf32> to vector<16x512xf32>
    %20 = arith.mulf %16, %19 : vector<16x512xf32>
    %c511_i32 = arith.constant 511 : i32
    %21 = tpu.dynamic_rotate %0 by %c511_i32 dim 1 : vector<16x512xf32>, i32 -> vector<16x512xf32>
    %c5 = arith.constant 5 : index
    %c0_10 = arith.constant 0 : index
    %c0_11 = arith.constant 0 : index
    %22 = vector.load %arg2[%c5, %c0_10, %c0_11] : memref<9x1x512xf32, #tpu.memory_space<vmem>>, vector<1x1x512xf32>
    %23 = vector.shape_cast %22 : vector<1x1x512xf32> to vector<1x512xf32>
    %24 = vector.broadcast %23 : vector<1x512xf32> to vector<16x512xf32>
    %25 = arith.mulf %21, %24 : vector<16x512xf32>
    %c497_i32 = arith.constant 497 : i32
    %26 = tpu.dynamic_rotate %0 by %c497_i32 dim 1 : vector<16x512xf32>, i32 -> vector<16x512xf32>
    %c6 = arith.constant 6 : index
    %c0_12 = arith.constant 0 : index
    %c0_13 = arith.constant 0 : index
    %27 = vector.load %arg2[%c6, %c0_12, %c0_13] : memref<9x1x512xf32, #tpu.memory_space<vmem>>, vector<1x1x512xf32>
    %28 = vector.shape_cast %27 : vector<1x1x512xf32> to vector<1x512xf32>
    %29 = vector.broadcast %28 : vector<1x512xf32> to vector<16x512xf32>
    %30 = arith.mulf %26, %29 : vector<16x512xf32>
    %c496_i32 = arith.constant 496 : i32
    %31 = tpu.dynamic_rotate %0 by %c496_i32 dim 1 : vector<16x512xf32>, i32 -> vector<16x512xf32>
    %c7 = arith.constant 7 : index
    %c0_14 = arith.constant 0 : index
    %c0_15 = arith.constant 0 : index
    %32 = vector.load %arg2[%c7, %c0_14, %c0_15] : memref<9x1x512xf32, #tpu.memory_space<vmem>>, vector<1x1x512xf32>
    %33 = vector.shape_cast %32 : vector<1x1x512xf32> to vector<1x512xf32>
    %34 = vector.broadcast %33 : vector<1x512xf32> to vector<16x512xf32>
    %35 = arith.mulf %31, %34 : vector<16x512xf32>
    %c495_i32 = arith.constant 495 : i32
    %36 = tpu.dynamic_rotate %0 by %c495_i32 dim 1 : vector<16x512xf32>, i32 -> vector<16x512xf32>
    %c8 = arith.constant 8 : index
    %c0_16 = arith.constant 0 : index
    %c0_17 = arith.constant 0 : index
    %37 = vector.load %arg2[%c8, %c0_16, %c0_17] : memref<9x1x512xf32, #tpu.memory_space<vmem>>, vector<1x1x512xf32>
    %38 = vector.shape_cast %37 : vector<1x1x512xf32> to vector<1x512xf32>
    %39 = vector.broadcast %38 : vector<1x512xf32> to vector<16x512xf32>
    %40 = arith.mulf %36, %39 : vector<16x512xf32>
    %41 = tpu.concatenate %5, %10, %15, %20, %0, %25, %30, %35, %40 in 0 : vector<16x512xf32>, vector<16x512xf32>, vector<16x512xf32>, vector<16x512xf32>, vector<16x512xf32>, vector<16x512xf32>, vector<16x512xf32>, vector<16x512xf32>, vector<16x512xf32> -> vector<144x512xf32>
    %c0_18 = arith.constant 0 : index
    %c0_19 = arith.constant 0 : index
    %42 = vector.load %arg3[%c0_18, %c0_19] : memref<16x144xf32, #tpu.memory_space<vmem>>, vector<16x144xf32>
    %cst = arith.constant dense<0.000000e+00> : vector<16x512xf32>
    %43 = tpu.matmul %42, %41, %cst {dimension_numbers = #tpu.dot_dimension_numbers<[1], [0], [0], [1], [0, 0, 1, 1], [], []>} : vector<16x144xf32>, vector<144x512xf32>, vector<16x512xf32> -> vector<16x512xf32>
    %c0_20 = arith.constant 0 : index
    %c0_21 = arith.constant 0 : index
    %44 = vector.load %arg4[%c0_20, %c0_21] : memref<16x1xf32, #tpu.memory_space<vmem>>, vector<16x1xf32>
    %45 = vector.broadcast %44 : vector<16x1xf32> to vector<16x512xf32>
    %46 = arith.addf %43, %45 : vector<16x512xf32>
    %cst_22 = arith.constant 0.000000e+00 : f32
    %47 = vector.broadcast %cst_22 : f32 to vector<16x512xf32>
    %48 = arith.maximumf %46, %47 : vector<16x512xf32>
    %c17_i32_23 = arith.constant 17 : i32
    %49 = tpu.dynamic_rotate %48 by %c17_i32_23 dim 1 : vector<16x512xf32>, i32 -> vector<16x512xf32>
    %c0_24 = arith.constant 0 : index
    %c0_25 = arith.constant 0 : index
    %c0_26 = arith.constant 0 : index
    %50 = vector.load %arg2[%c0_24, %c0_25, %c0_26] : memref<9x1x512xf32, #tpu.memory_space<vmem>>, vector<1x1x512xf32>
    %51 = vector.shape_cast %50 : vector<1x1x512xf32> to vector<1x512xf32>
    %52 = vector.broadcast %51 : vector<1x512xf32> to vector<16x512xf32>
    %53 = arith.mulf %49, %52 : vector<16x512xf32>
    %c16_i32_27 = arith.constant 16 : i32
    %54 = tpu.dynamic_rotate %48 by %c16_i32_27 dim 1 : vector<16x512xf32>, i32 -> vector<16x512xf32>
    %c1_28 = arith.constant 1 : index
    %c0_29 = arith.constant 0 : index
    %c0_30 = arith.constant 0 : index
    %55 = vector.load %arg2[%c1_28, %c0_29, %c0_30] : memref<9x1x512xf32, #tpu.memory_space<vmem>>, vector<1x1x512xf32>
    %56 = vector.shape_cast %55 : vector<1x1x512xf32> to vector<1x512xf32>
    %57 = vector.broadcast %56 : vector<1x512xf32> to vector<16x512xf32>
    %58 = arith.mulf %54, %57 : vector<16x512xf32>
    %c15_i32_31 = arith.constant 15 : i32
    %59 = tpu.dynamic_rotate %48 by %c15_i32_31 dim 1 : vector<16x512xf32>, i32 -> vector<16x512xf32>
    %c2_32 = arith.constant 2 : index
    %c0_33 = arith.constant 0 : index
    %c0_34 = arith.constant 0 : index
    %60 = vector.load %arg2[%c2_32, %c0_33, %c0_34] : memref<9x1x512xf32, #tpu.memory_space<vmem>>, vector<1x1x512xf32>
    %61 = vector.shape_cast %60 : vector<1x1x512xf32> to vector<1x512xf32>
    %62 = vector.broadcast %61 : vector<1x512xf32> to vector<16x512xf32>
    %63 = arith.mulf %59, %62 : vector<16x512xf32>
    %c1_i32_35 = arith.constant 1 : i32
    %64 = tpu.dynamic_rotate %48 by %c1_i32_35 dim 1 : vector<16x512xf32>, i32 -> vector<16x512xf32>
    %c3_36 = arith.constant 3 : index
    %c0_37 = arith.constant 0 : index
    %c0_38 = arith.constant 0 : index
    %65 = vector.load %arg2[%c3_36, %c0_37, %c0_38] : memref<9x1x512xf32, #tpu.memory_space<vmem>>, vector<1x1x512xf32>
    %66 = vector.shape_cast %65 : vector<1x1x512xf32> to vector<1x512xf32>
    %67 = vector.broadcast %66 : vector<1x512xf32> to vector<16x512xf32>
    %68 = arith.mulf %64, %67 : vector<16x512xf32>
    %c511_i32_39 = arith.constant 511 : i32
    %69 = tpu.dynamic_rotate %48 by %c511_i32_39 dim 1 : vector<16x512xf32>, i32 -> vector<16x512xf32>
    %c5_40 = arith.constant 5 : index
    %c0_41 = arith.constant 0 : index
    %c0_42 = arith.constant 0 : index
    %70 = vector.load %arg2[%c5_40, %c0_41, %c0_42] : memref<9x1x512xf32, #tpu.memory_space<vmem>>, vector<1x1x512xf32>
    %71 = vector.shape_cast %70 : vector<1x1x512xf32> to vector<1x512xf32>
    %72 = vector.broadcast %71 : vector<1x512xf32> to vector<16x512xf32>
    %73 = arith.mulf %69, %72 : vector<16x512xf32>
    %c497_i32_43 = arith.constant 497 : i32
    %74 = tpu.dynamic_rotate %48 by %c497_i32_43 dim 1 : vector<16x512xf32>, i32 -> vector<16x512xf32>
    %c6_44 = arith.constant 6 : index
    %c0_45 = arith.constant 0 : index
    %c0_46 = arith.constant 0 : index
    %75 = vector.load %arg2[%c6_44, %c0_45, %c0_46] : memref<9x1x512xf32, #tpu.memory_space<vmem>>, vector<1x1x512xf32>
    %76 = vector.shape_cast %75 : vector<1x1x512xf32> to vector<1x512xf32>
    %77 = vector.broadcast %76 : vector<1x512xf32> to vector<16x512xf32>
    %78 = arith.mulf %74, %77 : vector<16x512xf32>
    %c496_i32_47 = arith.constant 496 : i32
    %79 = tpu.dynamic_rotate %48 by %c496_i32_47 dim 1 : vector<16x512xf32>, i32 -> vector<16x512xf32>
    %c7_48 = arith.constant 7 : index
    %c0_49 = arith.constant 0 : index
    %c0_50 = arith.constant 0 : index
    %80 = vector.load %arg2[%c7_48, %c0_49, %c0_50] : memref<9x1x512xf32, #tpu.memory_space<vmem>>, vector<1x1x512xf32>
    %81 = vector.shape_cast %80 : vector<1x1x512xf32> to vector<1x512xf32>
    %82 = vector.broadcast %81 : vector<1x512xf32> to vector<16x512xf32>
    %83 = arith.mulf %79, %82 : vector<16x512xf32>
    %c495_i32_51 = arith.constant 495 : i32
    %84 = tpu.dynamic_rotate %48 by %c495_i32_51 dim 1 : vector<16x512xf32>, i32 -> vector<16x512xf32>
    %c8_52 = arith.constant 8 : index
    %c0_53 = arith.constant 0 : index
    %c0_54 = arith.constant 0 : index
    %85 = vector.load %arg2[%c8_52, %c0_53, %c0_54] : memref<9x1x512xf32, #tpu.memory_space<vmem>>, vector<1x1x512xf32>
    %86 = vector.shape_cast %85 : vector<1x1x512xf32> to vector<1x512xf32>
    %87 = vector.broadcast %86 : vector<1x512xf32> to vector<16x512xf32>
    %88 = arith.mulf %84, %87 : vector<16x512xf32>
    %89 = tpu.concatenate %53, %58, %63, %68, %48, %73, %78, %83, %88 in 0 : vector<16x512xf32>, vector<16x512xf32>, vector<16x512xf32>, vector<16x512xf32>, vector<16x512xf32>, vector<16x512xf32>, vector<16x512xf32>, vector<16x512xf32>, vector<16x512xf32> -> vector<144x512xf32>
    %c0_55 = arith.constant 0 : index
    %c0_56 = arith.constant 0 : index
    %90 = vector.load %arg5[%c0_55, %c0_56] : memref<16x144xf32, #tpu.memory_space<vmem>>, vector<16x144xf32>
    %cst_57 = arith.constant dense<0.000000e+00> : vector<16x512xf32>
    %91 = tpu.matmul %90, %89, %cst_57 {dimension_numbers = #tpu.dot_dimension_numbers<[1], [0], [0], [1], [0, 0, 1, 1], [], []>} : vector<16x144xf32>, vector<144x512xf32>, vector<16x512xf32> -> vector<16x512xf32>
    %c0_58 = arith.constant 0 : index
    %c0_59 = arith.constant 0 : index
    %92 = vector.load %arg6[%c0_58, %c0_59] : memref<16x1xf32, #tpu.memory_space<vmem>>, vector<16x1xf32>
    %93 = vector.broadcast %92 : vector<16x1xf32> to vector<16x512xf32>
    %94 = arith.addf %91, %93 : vector<16x512xf32>
    %cst_60 = arith.constant 1.000000e+00 : f32
    %95 = vector.broadcast %cst_60 : f32 to vector<16x512xf32>
    %96 = arith.mulf %94, %95 : vector<16x512xf32>
    %97 = arith.addf %96, %0 : vector<16x512xf32>
    %c0_61 = arith.constant 0 : index
    %c0_62 = arith.constant 0 : index
    %98 = vector.load %arg7[%c0_61, %c0_62] : memref<16x512xf32, #tpu.memory_space<vmem>>, vector<16x512xf32>
    tpu.vector_store %arg7[%c0_61, %c0_62], %97 {strides = array<i32>} : memref<16x512xf32, #tpu.memory_space<vmem>>, vector<16x512xf32>,
    return
  }
  func.func @transform_0(%arg0: i32) -> (i32, i32) {
    %c0_i32 = arith.constant 0 : i32
    %c0_i32_0 = arith.constant 0 : i32
    return %c0_i32, %arg0 : i32, i32
  }
  func.func @transform_1(%arg0: i32) -> (i32, i32, i32) {
    %c0_i32 = arith.constant 0 : i32
    %c0_i32_0 = arith.constant 0 : i32
    %c0_i32_1 = arith.constant 0 : i32
    %c0_i32_2 = arith.constant 0 : i32
    return %c0_i32, %c0_i32_0, %c0_i32_1 : i32, i32, i32
  }
  func.func @transform_2(%arg0: i32) -> (i32, i32) {
    %c0_i32 = arith.constant 0 : i32
    %c0_i32_0 = arith.constant 0 : i32
    %c0_i32_1 = arith.constant 0 : i32
    return %c0_i32, %c0_i32_0 : i32, i32
  }
  func.func @transform_3(%arg0: i32) -> (i32, i32) {
    %c0_i32 = arith.constant 0 : i32
    %c0_i32_0 = arith.constant 0 : i32
    %c0_i32_1 = arith.constant 0 : i32
    return %c0_i32, %c0_i32_0 : i32, i32
  }
  func.func @transform_4(%arg0: i32) -> (i32, i32) {
    %c0_i32 = arith.constant 0 : i32
    %c0_i32_0 = arith.constant 0 : i32
    %c0_i32_1 = arith.constant 0 : i32
    return %c0_i32, %c0_i32_0 : i32, i32
  }
  func.func @transform_5(%arg0: i32) -> (i32, i32) {
    %c0_i32 = arith.constant 0 : i32
    %c0_i32_0 = arith.constant 0 : i32
    %c0_i32_1 = arith.constant 0 : i32
    return %c0_i32, %c0_i32_0 : i32, i32
  }
  func.func @transform_6(%arg0: i32) -> (i32, i32) {
    %c0_i32 = arith.constant 0 : i32
    %c0_i32_0 = arith.constant 0 : i32
    return %c0_i32, %arg0 : i32, i32
  }
}

</mosaic_0001>

<bundles_post_ra>
// kernel: tpu_custom_call.1
= control target key start
LH: loop header
LB: loop body
LE: loop exit
PB: predicated region body
PF: predicated region fallthrough
CT: control target
= control target key end

     0   :  { %11 = vsyncpa [#allocation3], 0  ;;  %s3207_s0 = inlined_call_operand.hbm [shape: f32[16,1024], index: 0, kind: input, shape index: {}]   ;;  %s3208_s1 = inlined_call_operand.vmem [shape: f32[9,1,512], index: 1, kind: input, shape index: {}]   ;;  %s3209_s2 = inlined_call_operand.hbm [shape: f32[16,144], index: 2, kind: input, shape index: {}]   ;;  %s3210_s3 = inlined_call_operand.vmem [shape: f32[16,1], index: 3, kind: input, shape index: {}]   ;;  %s3211_s4 = inlined_call_operand.hbm [shape: f32[16,144], index: 4, kind: input, shape index: {}]   ;;  %s3212_s5 = inlined_call_operand.vmem [shape: f32[16,1], index: 5, kind: input, shape index: {}]   ;;  %s3213_s6 = inlined_call_operand.hbm [shape: f32[16,1024], index: 6, kind: output, shape index: {}]  }
   0x1   :  { %13 = vsyncpa [#allocation3 + $0x1], 0 }
   0x2   :  { %14 = vsyncpa [#allocation6], 0 }
   0x3   :  { %15 = vsyncpa [#allocation4], 0 }
   0x4   :  { %17 = vsyncpa [#allocation4 + $0x1], 0  ;;  %s1984_s21 = smov 0   ;;  %s1986_s22 = smov 0  }
   0x5   :  { %s1988_s23 = smov 0   ;;  %s1990_s24 = smov 0  }
   0x6 LB: > { %s2005_s25 = sadd.s32 4294967295, %s1926_s24   ;;  %s1497_s26 = sadd.s32 4294967294, %s1926_s24   ;;  %s1926_s24 = sphi %s1990_s24, %s3330_s24   ;;  %s1922_s23 = sphi %s1988_s23, %s3329_s23   ;;  %s1918_s22 = sphi %s1986_s22, %s3328_s22   ;;  %s1914_s21 = sphi %s1984_s21, %s3327_s21  }
   0x7   : > { %s2009_s27 = sadd.s32 1, %s1926_s24   ;;  %s30_s28 = sadd.s32 1, %s1922_s23 }
   0x8   : > { %s27_s29 = ssub.s32 %s1926_s24, %s2009_s27  ;;  %p37_p0 = scmp.ne.s32.totalorder %s1922_s23, %s1918_s22 }
   0x9   : > { %p28_p1 = scmp.eq.s32.totalorder %s27_s29, 0  ;;  %p38_p2 = scmp.eq.s32.totalorder %s1926_s24, 0 }
   0xa   : > { %p43_p3 = scmp.ne.s32.totalorder %s1918_s22, %s1914_s21  ;;  %p3214_p4 = scmp.eq.s32.totalorder %s2005_s25, 0 }
   0xb   : > { %s2021_s30 = scalar_select %p28_p1, %s1922_s23, %s30_s28  }
   0xc   : > { %p2023_p5 = por %p38_p2, %p37_p0  ;;  %p2029_p6 = por %p3214_p4, %p43_p3 }
   0xd   : > { %3256 = sst [smem:[#allocation12_spill]] %s2021_s30  ;;  %p172_p7 = scmp.eq.s32.totalorder %s2005_s25, 1 }
   0xe   : > { %s3257_s7 = scalar_select %p2023_p5, 1, 0 }
   0xf   : > { %s3258_s8 = scalar_select %p2029_p6, 1, 0 }
  0x10   : > { %p178_p8 = scmp.eq.s32.totalorder %s1497_s26, 1  ;;  %p1498_p9 = scmp.ge.s32.totalorder %s1926_s24, 1 }
  0x11   : > { %p185_p10 = scmp.lt.s32.totalorder %s1926_s24, 3  ;;  %p2036_p11 = por %p172_p7, %p37_p0 }
  0x12   : > { %p2040_p12 = por %p178_p8, %p43_p3  ;;  %s1928_s12 = smov [#allocation5]  }
  0x13   : > { %s3259_s9 = scalar_select %p2036_p11, 1, 0 }
  0x14   : > { %s3260_s10 = scalar_select %p2040_p12, 1, 0 }
  0x15   : > { %p2044_p13 = pnand %p1498_p9, %p185_p10  ;;  %s200_s13 = sshll.u32 %s1928_s12, 4  ;;  %s201_s13 = int_to_ptr.vmem [resolvable:$true] %s200_s13 }
  0x16   : > { %s1929_s15 = smov [#allocation7]   ;;  %s1770_s19 = scalar_lea.hbm %s3209_s2, 512 }
  0x17   : > { %s3261_s11 = scalar_select %p2044_p13, 1, 0 }
  0x18   : > { %p1688_p1 = pneg %p2044_p13  ;;  %s216_s16 = sshll.u32 %s1929_s15, 4  ;;  %s217_s16 = int_to_ptr.vmem [resolvable:$true] %s216_s16 }
  0x19   : > { %p1771_p7 = scmp.ne.s32.totalorder %s3209_s2, %s1770_s19 }
  0x1a   : > { %p2052_p2 = pnand %p1688_p1, %p3214_p4  ;;  %p1777_p1 = scmp.lt.u32.totalorder %s1770_s19, %s3209_s2 }
  0x1c   : > { %p1772_p8 = pneg %p2052_p2 }
  0x1e   : > { %p1773_p9 = pnand %p1772_p8, %p1771_p7 }
  0x20   : > { %p1774_p10 = pneg %p1773_p9 }
  0x22   : > { %p1779_p0 = pnand %p1777_p1, %p1774_p10 }
  0x24   : > { %1782 = shalt.err (!%p1779_p0)
}
  0x25   : > { %s1783_s12 = scalar_lea.vmem %s201_s13, 512  ;;  %p1791_p11 = scmp.lt.s32.totalorder %s201_s13, %s201_s13 }
  0x26   : > { %p1784_p4 = scmp.ne.s32.totalorder %s201_s13, %s1783_s12  ;;  %p1792_p6 = scmp.lt.s32.totalorder %s1783_s12, %s1783_s12 }
  0x28   : > { %p1786_p3 = pnand %p1784_p4, %p1772_p8  ;;  %p1793_p13 = por %p1792_p6, %p1791_p11 }
  0x2a   : > { %p1787_p12 = pneg %p1786_p3 }
  0x2c   : > { %p1794_p5 = pnand %p1793_p13, %p1787_p12 }
  0x2e   : > { %1797 = shalt.err (!%p1794_p5)
}
  0x2f   : > { %s1930_s15 = smov 256   ;;  %s1931_s17 = smov 16  }
  0x30   : > { %1691 = dma.hbm_to_vmem [thread:$0]  (!%p2052_p2), %s3209_s2, 512, %s201_s13, [#allocation6], %s1930_s15, %s1930_s15, %s1931_s17  }
  0x31   : > { %p3263_p0 = scmp.ne.s32.totalorder %s3257_s7, 0  ;;  %p3264_p7 = scmp.lt.s32.totalorder %s1926_s24, 2 }
  0x32   : > { %s1798_s29 = scalar_lea.hbm %s3211_s4, 512 }
  0x33   : > { %p2084_p4 = pnand %p3264_p7, %p3263_p0  ;;  %p1799_p5 = scmp.ne.s32.totalorder %s3211_s4, %s1798_s29 }
  0x34   : > { %p1805_p12 = scmp.lt.u32.totalorder %s1798_s29, %s3211_s4 }
  0x35   : > { %s3265_s20 = scalar_select %p2084_p4, 1, 0 }
  0x36   : > { %p1801_p6 = pnand %p1799_p5, %p1772_p8 }
  0x38   : > { %p1802_p11 = pneg %p1801_p6 }
  0x3a   : > { %p1807_p13 = pnand %p1805_p12, %p1802_p11 }
  0x3c   : > { %1810 = shalt.err (!%p1807_p13)
}
  0x3d   : > { %s1811_s18 = scalar_lea.vmem %s217_s16, 512  ;;  %p1819_p1 = scmp.lt.s32.totalorder %s217_s16, %s217_s16 }
  0x3e   : > { %p1812_p3 = scmp.ne.s32.totalorder %s217_s16, %s1811_s18  ;;  %p1820_p0 = scmp.lt.s32.totalorder %s1811_s18, %s1811_s18 }
  0x40   : > { %p1814_p9 = pnand %p1812_p3, %p1772_p8  ;;  %p1821_p7 = por %p1820_p0, %p1819_p1 }
  0x42   : > { %p1815_p10 = pneg %p1814_p9 }
  0x44   : > { %p1822_p4 = pnand %p1821_p7, %p1815_p10 }
  0x46   : > { %1825 = shalt.err (!%p1822_p4)
}
  0x47   : > { %1694 = dma.hbm_to_vmem [thread:$0]  (!%p2052_p2), %s3211_s4, 512, %s217_s16, [#allocation6], %s1930_s15, %s1930_s15, %s1931_s17  }
  0x48   : > { %s233_s26 = sand.u32 1, %s1922_s23   ;;  %s1530_s29 = sshll.u32 %s1926_s24, 9 }
  0x49   : > { %s1502_s28 = sshll.u32 %s233_s26, 6  ;;  %s2113_s7 = scalar_lea.hbm %s3207_s0, %s1530_s29 }
  0x4a   : > { %s237_s14 = scalar_lea.vmem [#allocation2], %s1502_s28  ;;  %s2117_s30 = scalar_lea.sflag [#allocation3], %s233_s26 }
  0x4b   : > { %s244_s18 = sshll.u32 %s237_s14, 4  ;;  %s1826_s19 = scalar_lea.hbm %s2113_s7, 1024  ;;  %s2115_s18 = int_to_ptr.vmem [resolvable:$true] %s244_s18 }
  0x4c   : > { %p1827_p2 = scmp.ne.s32.totalorder %s2113_s7, %s1826_s19  ;;  %p3266_p8 = scmp.ne.s32.totalorder %s3265_s20, 0 }
  0x4d   : > { %s1831_s17 = scalar_lea.hbm %s3207_s0, 2048  ;;  %p1832_p11 = scmp.lt.u32.totalorder %s2113_s7, %s3207_s0 }
  0x4e   : > { %p1828_p4 = pneg %p3266_p8  ;;  %p1833_p12 = scmp.lt.u32.totalorder %s1831_s17, %s1826_s19 }
  0x4f   : > { %p1835_p3 = scmp.lt.u32.totalorder %s1826_s19, %s2113_s7 }
  0x50   : > { %p1829_p5 = pnand %p1828_p4, %p1827_p2  ;;  %p1834_p13 = por %p1833_p12, %p1832_p11 }
  0x52   : > { %p1830_p6 = pneg %p1829_p5  ;;  %p1836_p9 = por %p1835_p3, %p1834_p13 }
  0x54   : > { %p1837_p10 = pnand %p1836_p9, %p1830_p6 }
  0x56   : > { %1840 = shalt.err (!%p1837_p10)
}
  0x57   : > { %s1841_s26 = scalar_lea.vmem %s2115_s18, 1024  ;;  %s1932_s28 = smov [#allocation2]  }
  0x58   : > { %p1842_p1 = scmp.ne.s32.totalorder %s2115_s18, %s1841_s26  ;;  %s1846_s13 = sshll.u32 %s1932_s28, 4  ;;  %s1847_s13 = int_to_ptr.vmem [resolvable:$false] %s1846_s13 }
  0x59   : > { %s1848_s14 = scalar_lea.vmem %s1847_s13, 2048  ;;  %p1849_p2 = scmp.lt.s32.totalorder %s2115_s18, %s1847_s13 }
  0x5a   : > { %p1844_p0 = pnand %p1842_p1, %p1828_p4  ;;  %p1850_p5 = scmp.lt.s32.totalorder %s1848_s14, %s1841_s26 }
  0x5c   : > { %p1845_p7 = pneg %p1844_p0  ;;  %p1851_p11 = por %p1850_p5, %p1849_p2 }
  0x5e   : > { %p1852_p12 = pnand %p1851_p11, %p1845_p7 }
  0x60   : > { %1855 = shalt.err (!%p1852_p12)
}
  0x61   : > { %s1933_s19 = smov 1024   ;;  %s1934_s16 = smov 512  }
  0x62   : > { %s1935_s15 = smov 32   ;;  %p3267_p4 = scmp.ne.s32.totalorder %s3261_s11, 0 }
  0x63   : > { %1698 = dma.hbm_to_vmem [thread:$0]  (!%p3266_p8), %s2113_s7, 1024, %s2115_s18, %s2117_s30, %s1933_s19, %s1934_s16, %s1935_s15  }
  0x64   : > { %256 = sbr.rel (%p3267_p4) target bundleno = 1064 (0x428), region = 44 }
  0x6b   : > { %s2148_s17 = sand.u32 1, %s1918_s22   ;;  %p3268_p6 = scmp.ne.s32.totalorder %s3258_s8, 0 }
  0x6c   : > { %s1506_s29 = sshll.u32 %s2148_s17, 6  ;;  %s259_s12 = scalar_lea.sflag [#allocation3], %s2148_s17 }
  0x6d   : > { %s2154_s26 = scalar_lea.vmem [#allocation2], %s1506_s29 }
  0x6e   : > { %1901 = dma.done.wait (%p3268_p6), %s259_s12, 1024  }
  0x6f   : > { %1903 = vsyncadd (%p3268_p6), %s259_s12, 4294966272  ;;  %p3269_p8 = scmp.eq.s32.totalorder %s2005_s25, 0 }
  0x71   : > { %1905 = dma.done.wait (%p3269_p8), [#allocation6], 1024   ;;  %p3270_p13 = pmov %p3269_p8 }
  0x72   : > { %v2165_v0 = vld [vmem:[%s2154_s26 + $0x8] sm:$0xff]  ;;  %v2168_v1 = vld [vmem:[%s2154_s26] sm:$0xff]  ;;  %s1936_s8 = smov 17   ;;  %v2185_v4 = vld [vmem:[%s2154_s26 + $0x30] sm:$0xff]  ;;  %s1937_s11 = smov 16   ;;  %v325_v8 = vlaneseq  ;;  %vm774_vm0 = vcmask 130048  }
  0x73   : > { %1907 = vsyncadd (%p3270_p13), [#allocation6], 4294966272  ;;  %313 = vrot.lane.b32.xlu1 %v2165_v0, %s1936_s8  ;;  %309 = vrot.lane.b32.xlu0 %v2168_v1, %s1936_s8  ;;  %v2175_v2 = vld [vmem:[%s2154_s26 + $0x28] sm:$0xff]  ;;  %v2178_v3 = vld [vmem:[%s2154_s26 + $0x20] sm:$0xff]  ;;  %s1938_s20 = smov 15   ;;  %s1939_s7 = smov 1  }
  0x74   : > { %v2188_v5 = vld [vmem:[%s2154_s26 + $0x10] sm:$0xff]  ;;  %v2195_v6 = vld [vmem:[%s2154_s26 + $0x38] sm:$0xff]  ;;  %s1940_s18 = smov 127   ;;  %s1941_s30 = smov 113   ;;  %v339_v9 = vshrl.u32 %v325_v8, 7  ;;  %v2300_v10 = vand.u32 127, %v325_v8 }
  0x75   : > { %v2198_v7 = vld [vmem:[%s2154_s26 + $0x18] sm:$0xff]  ;;  %s1942_s28 = smov 112   ;;  %s1943_s13 = smov 111   ;;  %v336_v12 = vld [vmem:[%s3208_s1] sm:$0xf]  ;;  %v759_v13 = vld [vmem:[#allocation5 + $0x8] sm:$0xff] }
  0x76   : > { %v2306_v11 = vsub.s32 1, %v339_v9  ;;  %vm327_vm1 = vcmp.lt.s32.totalorder %v2300_v10, 17  ;;  %1517 = vmatprep.mubr.msk.f32.mxu0 %vm774_vm0, %v759_v13  ;;  %1519 = vmatprep.mubr.msk.f32.mxu1 %vm774_vm0, %v759_v13  ;;  %v2323_v20 = vsub.s32 2, %v339_v9  ;;  %v2333_v24 = vsub.s32 0, %v339_v9  ;;  %v762_v35 = vld [vmem:[%s3210_s3] sm:$0xff]  ;;  %v763_v40 = vld [vmem:[%s3210_s3 + $0x8] sm:$0xff] }
  0x77   : > { %315 = vrot.lane.b32.xlu1 %v2175_v2, %s1936_s8  ;;  %311 = vrot.lane.b32.xlu0 %v2178_v3, %s1936_s8  ;;  %v2335_v25 = vsub.s32 3, %v339_v9  ;;  %v1944_v34 = vmov 0   ;;  %v1510_v49 = vld [vmem:[%s3208_s1 + $0x4] sm:$0xf]  ;;  %vm382_vm2 = vcmp.lt.s32.totalorder %v2300_v10, 16  ;;  %vm438_vm3 = vcmp.lt.s32.totalorder %v2300_v10, 15 }
  0x78   : > { %v2319_v16 = vrot.slane %v336_v12, %v2306_v11  ;;  %v2338_v29 = vrot.slane %v336_v12, %v2323_v20  ;;  %v2349_v32 = vrot.slane %v336_v12, %v2333_v24  ;;  %1760 = vset.pattern.permute.xlu0 %v1944_v34  ;;  %1761 = vset.pattern.permute.xlu1 %v1944_v34  ;;  %vm494_vm4 = vcmp.lt.s32.totalorder %v2300_v10, 1  ;;  %s1392_s14 = scalar_lea.sflag [#allocation4], %s2148_s17  ;;  %p3323_p9 = scmp.ne.s32.totalorder %s3259_s9, 0 }
  0x79   : > { %v2352_v33 = vrot.slane %v336_v12, %v2335_v25  ;;  %v2379_v55 = vrot.slane %v1510_v49, %v2306_v11  ;;  %v2388_v62 = vrot.slane %v1510_v49, %v2323_v20  ;;  %vm550_vm5 = vcmp.lt.s32.totalorder %v2300_v10, 127  ;;  %s1945_s16 = smov [#allocation8]  }
  0x7a   : > { %vm606_vm6 = vcmp.lt.s32.totalorder %v2300_v10, 113  ;;  %vm662_vm7 = vcmp.lt.s32.totalorder %v2300_v10, 112  ;;  %vm718_vm8 = vcmp.lt.s32.totalorder %v2300_v10, 111  ;;  %v1201_v10 = vld [vmem:[#allocation7 + $0x10] sm:$0xff]  ;;  %s1860_s15 = sshll.u32 %s1945_s16, 4  ;;  %s1861_s15 = int_to_ptr.vmem [resolvable:$false] %s1860_s15 }
  0x7b   : > { %319 = vrot.lane.b32.xlu1 %v2185_v4, %s1936_s8  ;;  %317 = vrot.lane.b32.xlu0 %v2188_v5, %s1936_s8  ;;  %s1862_s12 = scalar_lea.vmem %s1861_s15, 2048 }
  0x7f   : > { %323 = vrot.lane.b32.xlu1 %v2195_v6, %s1936_s8  ;;  %321 = vrot.lane.b32.xlu0 %v2198_v7, %s1936_s8 }
  0x83   : > { %368 = vrot.lane.b32.xlu1 %v2178_v3, %s1937_s11  ;;  %366 = vrot.lane.b32.xlu0 %v2168_v1, %s1937_s11 }
  0x87   : > { %372 = vrot.lane.b32.xlu1 %v2175_v2, %s1937_s11  ;;  %370 = vrot.lane.b32.xlu0 %v2165_v0, %s1937_s11 }
  0x8b   : > { %376 = vrot.lane.b32.xlu1 %v2185_v4, %s1937_s11  ;;  %374 = vrot.lane.b32.xlu0 %v2188_v5, %s1937_s11 }
  0x8f   : > { %380 = vrot.lane.b32.xlu1 %v2195_v6, %s1937_s11  ;;  %378 = vrot.lane.b32.xlu0 %v2198_v7, %s1937_s11 }
  0x93   : > { %424 = vrot.lane.b32.xlu1 %v2178_v3, %s1938_s20  ;;  %422 = vrot.lane.b32.xlu0 %v2168_v1, %s1938_s20 }
  0x97   : > { %428 = vrot.lane.b32.xlu1 %v2175_v2, %s1938_s20  ;;  %426 = vrot.lane.b32.xlu0 %v2165_v0, %s1938_s20 }
  0x9b   : > { %432 = vrot.lane.b32.xlu1 %v2185_v4, %s1938_s20  ;;  %430 = vrot.lane.b32.xlu0 %v2188_v5, %s1938_s20 }
  0x9f   : > { %436 = vrot.lane.b32.xlu1 %v2195_v6, %s1938_s20  ;;  %434 = vrot.lane.b32.xlu0 %v2198_v7, %s1938_s20 }
  0xa3   : > { %480 = vrot.lane.b32.xlu1 %v2178_v3, %s1939_s7  ;;  %478 = vrot.lane.b32.xlu0 %v2168_v1, %s1939_s7 }
  0xa7   : > { %484 = vrot.lane.b32.xlu1 %v2175_v2, %s1939_s7  ;;  %482 = vrot.lane.b32.xlu0 %v2165_v0, %s1939_s7 }
  0xab   : > { %488 = vrot.lane.b32.xlu1 %v2185_v4, %s1939_s7  ;;  %486 = vrot.lane.b32.xlu0 %v2188_v5, %s1939_s7 }
  0xaf   : > { %492 = vrot.lane.b32.xlu1 %v2195_v6, %s1939_s7  ;;  %490 = vrot.lane.b32.xlu0 %v2198_v7, %s1939_s7 }
  0xb3   : > { %536 = vrot.lane.b32.xlu1 %v2178_v3, %s1940_s18  ;;  %534 = vrot.lane.b32.xlu0 %v2168_v1, %s1940_s18 }
  0xb7   : > { %540 = vrot.lane.b32.xlu1 %v2175_v2, %s1940_s18  ;;  %538 = vrot.lane.b32.xlu0 %v2165_v0, %s1940_s18 }
  0xbb   : > { %544 = vrot.lane.b32.xlu1 %v2185_v4, %s1940_s18  ;;  %542 = vrot.lane.b32.xlu0 %v2188_v5, %s1940_s18 }
  0xbf   : > { %548 = vrot.lane.b32.xlu1 %v2195_v6, %s1940_s18  ;;  %546 = vrot.lane.b32.xlu0 %v2198_v7, %s1940_s18 }
  0xc3   : > { %592 = vrot.lane.b32.xlu1 %v2178_v3, %s1941_s30  ;;  %590 = vrot.lane.b32.xlu0 %v2168_v1, %s1941_s30 }
  0xc7   : > { %596 = vrot.lane.b32.xlu1 %v2175_v2, %s1941_s30  ;;  %594 = vrot.lane.b32.xlu0 %v2165_v0, %s1941_s30 }
  0xcb   : > { %600 = vrot.lane.b32.xlu1 %v2185_v4, %s1941_s30  ;;  %598 = vrot.lane.b32.xlu0 %v2188_v5, %s1941_s30 }
  0xcf   : > { %604 = vrot.lane.b32.xlu1 %v2195_v6, %s1941_s30  ;;  %602 = vrot.lane.b32.xlu0 %v2198_v7, %s1941_s30 }
  0xd3   : > { %648 = vrot.lane.b32.xlu1 %v2178_v3, %s1942_s28  ;;  %646 = vrot.lane.b32.xlu0 %v2168_v1, %s1942_s28 }
  0xd7   : > { %652 = vrot.lane.b32.xlu1 %v2175_v2, %s1942_s28  ;;  %650 = vrot.lane.b32.xlu0 %v2165_v0, %s1942_s28 }
  0xdb   : > { %656 = vrot.lane.b32.xlu1 %v2185_v4, %s1942_s28  ;;  %654 = vrot.lane.b32.xlu0 %v2188_v5, %s1942_s28 }
  0xdf   : > { %660 = vrot.lane.b32.xlu1 %v2195_v6, %s1942_s28  ;;  %658 = vrot.lane.b32.xlu0 %v2198_v7, %s1942_s28 }
  0xe3   : > { %704 = vrot.lane.b32.xlu1 %v2178_v3, %s1943_s13  ;;  %702 = vrot.lane.b32.xlu0 %v2168_v1, %s1943_s13 }
  0xe5   : > { %v314_v14 = vpop.permute.xlu1 %313  ;;  %v310_v15 = vpop.permute.xlu0 %309 }
  0xe6   : > { %v332_v17 = vsel %vm327_vm1, %v310_v15, %v314_v14 }
  0xe7   : > { %708 = vrot.lane.b32.xlu1 %v2175_v2, %s1943_s13  ;;  %706 = vrot.lane.b32.xlu0 %v2165_v0, %s1943_s13  ;;  %v359_v22 = vmul.f32 %v2319_v16, %v332_v17 }
  0xe9   : > { %v316_v18 = vpop.permute.xlu1 %315  ;;  %v312_v19 = vpop.permute.xlu0 %311 }
  0xea   : > { %v333_v21 = vsel %vm327_vm1, %v312_v19, %v316_v18 }
  0xeb   : > { %712 = vrot.lane.b32.xlu1 %v2185_v4, %s1943_s13  ;;  %710 = vrot.lane.b32.xlu0 %v2188_v5, %s1943_s13  ;;  %v363_v23 = vmul.f32 %v2319_v16, %v333_v21 }
  0xed   : > { %v320_v26 = vpop.permute.xlu1 %319  ;;  %v318_v27 = vpop.permute.xlu0 %317  ;;  %v1532_v28 = vpack.c.bf16 %v363_v23, %v359_v22 }
  0xee   : > { %v331_v30 = vsel %vm327_vm1, %v316_v18, %v320_v26  ;;  %v330_v31 = vsel %vm327_vm1, %v314_v14, %v318_v27  ;;  %v2395_v14 = vrot.slane %v1510_v49, %v2333_v24 }
  0xef   : > { %716 = vrot.lane.b32.xlu1 %v2195_v6, %s1943_s13  ;;  %714 = vrot.lane.b32.xlu0 %v2198_v7, %s1943_s13  ;;  %v360_v38 = vmul.f32 %v2338_v29, %v330_v31  ;;  %v364_v39 = vmul.f32 %v2338_v29, %v331_v30 }
  0xf0   : > { %1533 = vmatprep.subr.bf16.mxu0 %v1532_v28 }
  0xf1   : > { %v324_v36 = vpop.permute.xlu1 %323  ;;  %v322_v37 = vpop.permute.xlu0 %321  ;;  %v1570_v54 = vpack.c.bf16 %v364_v39, %v360_v38 }
  0xf2   : > { %v335_v41 = vsel %vm327_vm1, %v324_v36, %v312_v19  ;;  %v334_v42 = vsel %vm327_vm1, %v322_v37, %v310_v15  ;;  %v328_v43 = vsel %vm327_vm1, %v318_v27, %v322_v37  ;;  %v329_v44 = vsel %vm327_vm1, %v320_v26, %v324_v36 }
  0xf3   : > { %v358_v45 = vmul.f32 %v2349_v32, %v334_v42  ;;  %v362_v46 = vmul.f32 %v2349_v32, %v335_v41  ;;  %v361_v47 = vmul.f32 %v2352_v33, %v328_v43  ;;  %v365_v48 = vmul.f32 %v2352_v33, %v329_v44  ;;  %766 = vperm.xlu0 %1760, %v762_v35   ;;  %v1511_v35 = vld [vmem:[%s3208_s1 + $0x8] sm:$0xf] }
  0xf4   : > { %771 = vperm.xlu1 %1761, %v763_v40   ;;  %v2398_v15 = vrot.slane %v1510_v49, %v2335_v25  ;;  %v2419_v41 = vrot.slane %v1511_v35, %v2306_v11 }
  0xf5   : > { %v369_v50 = vpop.permute.xlu1 %368  ;;  %v367_v51 = vpop.permute.xlu0 %366  ;;  %v1534_v52 = vpack.c.bf16 %v362_v46, %v358_v45  ;;  %v1568_v53 = vpack.c.bf16 %v365_v48, %v361_v47  ;;  %v2428_v48 = vrot.slane %v1511_v35, %v2323_v20 }
  0xf7   : > { %1535 = vmatpush1.bf16.msra.mxu0 %v1534_v52  ;;  %1569 = vmatprep.subr.bf16.mxu1 %v1568_v53 }
  0xf8   : > { %1571 = vmatpush1.bf16.msra.mxu1 %v1570_v54  ;;  %v2435_v54 = vrot.slane %v1511_v35, %v2333_v24 }
  0xf9   : > { %v373_v56 = vpop.permute.xlu1 %372  ;;  %v371_v57 = vpop.permute.xlu0 %370 }
  0xfa   : > { %v388_v58 = vsel %vm382_vm2, %v369_v50, %v373_v56  ;;  %v387_v59 = vsel %vm382_vm2, %v367_v51, %v371_v57 }
  0xfb   : > { %v419_v60 = vmul.f32 %v2379_v55, %v388_v58  ;;  %v415_v61 = vmul.f32 %v2379_v55, %v387_v59 }
  0xfd   : > { %v377_v63 = vpop.permute.xlu1 %376  ;;  %v375_v8 = vpop.permute.xlu0 %374  ;;  %v1536_v9 = vpack.c.bf16 %v419_v60, %v415_v61 }
  0xfe   : > { %v386_v12 = vsel %vm382_vm2, %v373_v56, %v377_v63  ;;  %v385_v13 = vsel %vm382_vm2, %v371_v57, %v375_v8  ;;  %v2438_v56 = vrot.slane %v1511_v35, %v2335_v25 }
  0xff   : > { %1537 = vmatprep.subr.bf16.mxu0 %v1536_v9  ;;  %v420_v17 = vmul.f32 %v2388_v62, %v386_v12  ;;  %v416_v18 = vmul.f32 %v2388_v62, %v385_v13 }
 0x101   : > { %v381_v19 = vpop.permute.xlu1 %380  ;;  %v379_v21 = vpop.permute.xlu0 %378  ;;  %v1574_v40 = vpack.c.bf16 %v420_v17, %v416_v18 }
 0x102   : > { %v384_v22 = vsel %vm382_vm2, %v377_v63, %v381_v19  ;;  %v390_v23 = vsel %vm382_vm2, %v381_v19, %v369_v50  ;;  %v383_v26 = vsel %vm382_vm2, %v375_v8, %v379_v21  ;;  %v389_v27 = vsel %vm382_vm2, %v379_v21, %v367_v51  ;;  %v1512_v19 = vld [vmem:[%s3208_s1 + $0xc] sm:$0xf] }
 0x103   : > { %v418_v28 = vmul.f32 %v2395_v14, %v390_v23  ;;  %v421_v30 = vmul.f32 %v2398_v15, %v384_v22  ;;  %v414_v31 = vmul.f32 %v2395_v14, %v389_v27  ;;  %v417_v34 = vmul.f32 %v2398_v15, %v383_v26 }
 0x105   : > { %v425_v36 = vpop.permute.xlu1 %424  ;;  %v423_v37 = vpop.permute.xlu0 %422  ;;  %v1538_v38 = vpack.c.bf16 %v418_v28, %v414_v31  ;;  %v1572_v39 = vpack.c.bf16 %v421_v30, %v417_v34  ;;  %v2459_v28 = vrot.slane %v1512_v19, %v2306_v11 }
 0x107   : > { %1539 = vmatpush1.bf16.msra.mxu0 %v1538_v38  ;;  %1573 = vmatprep.subr.bf16.mxu1 %v1572_v39  ;;  %v2468_v38 = vrot.slane %v1512_v19, %v2323_v20 }
 0x108   : > { %1575 = vmatpush1.bf16.msra.mxu1 %v1574_v40 }
 0x109   : > { %v429_v42 = vpop.permute.xlu1 %428  ;;  %v427_v43 = vpop.permute.xlu0 %426 }
 0x10a   : > { %v444_v44 = vsel %vm438_vm3, %v425_v36, %v429_v42  ;;  %v443_v45 = vsel %vm438_vm3, %v423_v37, %v427_v43 }
 0x10b   : > { %v475_v46 = vmul.f32 %v2419_v41, %v444_v44  ;;  %v471_v47 = vmul.f32 %v2419_v41, %v443_v45  ;;  %v2475_v45 = vrot.slane %v1512_v19, %v2333_v24 }
 0x10d   : > { %v433_v49 = vpop.permute.xlu1 %432  ;;  %v431_v50 = vpop.permute.xlu0 %430  ;;  %v1540_v51 = vpack.c.bf16 %v475_v46, %v471_v47  ;;  %v2478_v46 = vrot.slane %v1512_v19, %v2335_v25 }
 0x10e   : > { %v442_v52 = vsel %vm438_vm3, %v429_v42, %v433_v49  ;;  %v441_v53 = vsel %vm438_vm3, %v427_v43, %v431_v50 }
 0x10f   : > { %1541 = vmatprep.subr.bf16.mxu0 %v1540_v51  ;;  %v476_v57 = vmul.f32 %v2428_v48, %v442_v52  ;;  %v472_v58 = vmul.f32 %v2428_v48, %v441_v53 }
 0x111   : > { %v437_v59 = vpop.permute.xlu1 %436  ;;  %v435_v60 = vpop.permute.xlu0 %434  ;;  %v1578_v27 = vpack.c.bf16 %v476_v57, %v472_v58 }
 0x112   : > { %v440_v61 = vsel %vm438_vm3, %v433_v49, %v437_v59  ;;  %v446_v63 = vsel %vm438_vm3, %v437_v59, %v425_v36  ;;  %v439_v8 = vsel %vm438_vm3, %v431_v50, %v435_v60  ;;  %v445_v9 = vsel %vm438_vm3, %v435_v60, %v423_v37 }
 0x113   : > { %v474_v12 = vmul.f32 %v2435_v54, %v446_v63  ;;  %v477_v13 = vmul.f32 %v2438_v56, %v440_v61  ;;  %v470_v17 = vmul.f32 %v2435_v54, %v445_v9  ;;  %v473_v18 = vmul.f32 %v2438_v56, %v439_v8 }
 0x114   : > { %v1548_v8 = vpack.c.bf16 %v2175_v2, %v2165_v0  ;;  %v1586_v0 = vpack.c.bf16 %v2185_v4, %v2188_v5 }
 0x115   : > { %v481_v21 = vpop.permute.xlu1 %480  ;;  %v479_v22 = vpop.permute.xlu0 %478  ;;  %v1542_v23 = vpack.c.bf16 %v474_v12, %v470_v17  ;;  %v1576_v26 = vpack.c.bf16 %v477_v13, %v473_v18  ;;  %v1584_v18 = vpack.c.bf16 %v2195_v6, %v2198_v7 }
 0x117   : > { %1543 = vmatpush1.bf16.msra.mxu0 %v1542_v23  ;;  %1577 = vmatprep.subr.bf16.mxu1 %v1576_v26 }
 0x118   : > { %1579 = vmatpush1.bf16.msra.mxu1 %v1578_v27 }
 0x119   : > { %v485_v30 = vpop.permute.xlu1 %484  ;;  %v483_v31 = vpop.permute.xlu0 %482 }
 0x11a   : > { %v500_v34 = vsel %vm494_vm4, %v481_v21, %v485_v30  ;;  %v499_v35 = vsel %vm494_vm4, %v479_v22, %v483_v31 }
 0x11b   : > { %v531_v36 = vmul.f32 %v2459_v28, %v500_v34  ;;  %v527_v37 = vmul.f32 %v2459_v28, %v499_v35 }
 0x11d   : > { %v489_v39 = vpop.permute.xlu1 %488  ;;  %v487_v40 = vpop.permute.xlu0 %486  ;;  %v1544_v42 = vpack.c.bf16 %v531_v36, %v527_v37 }
 0x11e   : > { %v498_v43 = vsel %vm494_vm4, %v485_v30, %v489_v39  ;;  %v497_v44 = vsel %vm494_vm4, %v483_v31, %v487_v40 }
 0x11f   : > { %1545 = vmatprep.subr.bf16.mxu0 %v1544_v42  ;;  %v532_v47 = vmul.f32 %v2468_v38, %v498_v43  ;;  %v528_v49 = vmul.f32 %v2468_v38, %v497_v44 }
 0x121   : > { %v493_v50 = vpop.permute.xlu1 %492  ;;  %v491_v51 = vpop.permute.xlu0 %490  ;;  %v1582_v19 = vpack.c.bf16 %v532_v47, %v528_v49 }
 0x122   : > { %v496_v52 = vsel %vm494_vm4, %v489_v39, %v493_v50  ;;  %v502_v53 = vsel %vm494_vm4, %v493_v50, %v481_v21  ;;  %v495_v57 = vsel %vm494_vm4, %v487_v40, %v491_v51  ;;  %v501_v58 = vsel %vm494_vm4, %v491_v51, %v479_v22  ;;  %v1513_v21 = vld [vmem:[%s3208_s1 + $0x14] sm:$0xf] }
 0x123   : > { %v530_v59 = vmul.f32 %v2475_v45, %v502_v53  ;;  %v533_v60 = vmul.f32 %v2478_v46, %v496_v52  ;;  %v526_v61 = vmul.f32 %v2475_v45, %v501_v58  ;;  %v529_v63 = vmul.f32 %v2478_v46, %v495_v57 }
 0x124   : > { %v1550_v22 = vpack.c.bf16 %v2178_v3, %v2168_v1  ;;  %v2507_v2 = vrot.slane %v1513_v21, %v2333_v24  ;;  %v2514_v27 = vrot.slane %v1513_v21, %v2306_v11  ;;  %v2525_v36 = vrot.slane %v1513_v21, %v2323_v20 }
 0x125   : > { %v537_v9 = vpop.permute.xlu1 %536  ;;  %v535_v12 = vpop.permute.xlu0 %534  ;;  %v1546_v13 = vpack.c.bf16 %v530_v59, %v526_v61  ;;  %v1580_v17 = vpack.c.bf16 %v533_v60, %v529_v63  ;;  %v2528_v37 = vrot.slane %v1513_v21, %v2335_v25  ;;  %v1514_v63 = vld [vmem:[%s3208_s1 + $0x18] sm:$0xf] }
 0x127   : > { %1547 = vmatpush1.bf16.msra.mxu0 %v1546_v13  ;;  %1581 = vmatprep.subr.bf16.mxu1 %v1580_v17 }
 0x128   : > { %1583 = vmatpush1.bf16.msra.mxu1 %v1582_v19  ;;  %1549 = vmatprep.subr.bf16.mxu0 %v1548_v8  ;;  %v2547_v8 = vrot.slane %v1514_v63, %v2333_v24 }
 0x129   : > { %v541_v6 = vpop.permute.xlu1 %540  ;;  %v539_v7 = vpop.permute.xlu0 %538  ;;  %1585 = vmatprep.subr.bf16.mxu1 %v1584_v18  ;;  %v2554_v18 = vrot.slane %v1514_v63, %v2306_v11 }
 0x12a   : > { %v556_v23 = vsel %vm550_vm5, %v537_v9, %v541_v6  ;;  %v555_v26 = vsel %vm550_vm5, %v535_v12, %v539_v7  ;;  %3271 = vst [vmem:[#allocation13_spill] sm:$0xff] %v2547_v8 }
 0x12b   : > { %1551 = vmatpush1.bf16.msra.mxu0 %v1550_v22  ;;  %v586_v1 = vmul.f32 %v2507_v2, %v556_v23  ;;  %v582_v3 = vmul.f32 %v2507_v2, %v555_v26  ;;  %3272 = vst [vmem:[#allocation14_spill] sm:$0xff] %v2554_v18 }
 0x12c   : > { %1587 = vmatpush1.bf16.msra.mxu1 %v1586_v0 }
 0x12d   : > { %v545_v4 = vpop.permute.xlu1 %544  ;;  %v543_v5 = vpop.permute.xlu0 %542  ;;  %v1554_v43 = vpack.c.bf16 %v586_v1, %v582_v3  ;;  %v2565_v1 = vrot.slane %v1514_v63, %v2323_v20  ;;  %v2568_v3 = vrot.slane %v1514_v63, %v2335_v25 }
 0x12e   : > { %v554_v30 = vsel %vm550_vm5, %v541_v6, %v545_v4  ;;  %v553_v31 = vsel %vm550_vm5, %v539_v7, %v543_v5 }
 0x12f   : > { %v587_v34 = vmul.f32 %v2514_v27, %v554_v30  ;;  %v583_v35 = vmul.f32 %v2514_v27, %v553_v31  ;;  %3273 = vst [vmem:[#allocation15_spill] sm:$0xff] %v2565_v1  ;;  %3274 = vst [vmem:[#allocation16_spill] sm:$0xff] %v2568_v3 }
 0x131   : > { %v549_v39 = vpop.permute.xlu1 %548  ;;  %v547_v40 = vpop.permute.xlu0 %546  ;;  %v1552_v42 = vpack.c.bf16 %v587_v34, %v583_v35 }
 0x132   : > { %v552_v44 = vsel %vm550_vm5, %v545_v4, %v549_v39  ;;  %v558_v47 = vsel %vm550_vm5, %v549_v39, %v537_v9  ;;  %v551_v49 = vsel %vm550_vm5, %v543_v5, %v547_v40  ;;  %v557_v50 = vsel %vm550_vm5, %v547_v40, %v535_v12 }
 0x133   : > { %v588_v51 = vmul.f32 %v2525_v36, %v552_v44  ;;  %v589_v52 = vmul.f32 %v2528_v37, %v558_v47  ;;  %v584_v53 = vmul.f32 %v2525_v36, %v551_v49  ;;  %v585_v57 = vmul.f32 %v2528_v37, %v557_v50  ;;  %1553 = vmatprep.subr.bf16.mxu0 %v1552_v42 }
 0x134   : > { %1555 = vmatpush1.bf16.msra.mxu0 %v1554_v43 }
 0x135   : > { %v593_v58 = vpop.permute.xlu1 %592  ;;  %v591_v59 = vpop.permute.xlu0 %590  ;;  %v1588_v60 = vpack.c.bf16 %v589_v52, %v585_v57  ;;  %v1590_v61 = vpack.c.bf16 %v588_v51, %v584_v53  ;;  %v1515_v53 = vld [vmem:[%s3208_s1 + $0x1c] sm:$0xf] }
 0x136   : > { %v2587_v57 = vrot.slane %v1515_v53, %v2333_v24  ;;  %v2594_v63 = vrot.slane %v1515_v53, %v2306_v11 }
 0x137   : > { %1589 = vmatprep.subr.bf16.mxu1 %v1588_v60 }
 0x138   : > { %1591 = vmatpush1.bf16.msra.mxu1 %v1590_v61  ;;  %3275 = vst [vmem:[#allocation17_spill] sm:$0xff] %v2587_v57  ;;  %3276 = vst [vmem:[#allocation18_spill] sm:$0xff] %v2594_v63 }
 0x139   : > { %v597_v9 = vpop.permute.xlu1 %596  ;;  %v595_v12 = vpop.permute.xlu0 %594 }
 0x13a   : > { %v612_v13 = vsel %vm606_vm6, %v593_v58, %v597_v9  ;;  %v611_v17 = vsel %vm606_vm6, %v591_v59, %v595_v12 }
 0x13b   : > { %v642_v19 = vmul.f32 %v2547_v8, %v612_v13  ;;  %v638_v21 = vmul.f32 %v2547_v8, %v611_v17 }
 0x13d   : > { %v601_v22 = vpop.permute.xlu1 %600  ;;  %v599_v0 = vpop.permute.xlu0 %598  ;;  %v1558_v31 = vpack.c.bf16 %v642_v19, %v638_v21 }
 0x13e   : > { %v610_v6 = vsel %vm606_vm6, %v597_v9, %v601_v22  ;;  %v609_v7 = vsel %vm606_vm6, %v595_v12, %v599_v0 }
 0x13f   : > { %v643_v23 = vmul.f32 %v2554_v18, %v610_v6  ;;  %v639_v26 = vmul.f32 %v2554_v18, %v609_v7  ;;  %v2605_v6 = vrot.slane %v1515_v53, %v2323_v20  ;;  %v2608_v7 = vrot.slane %v1515_v53, %v2335_v25 }
 0x141   : > { %v605_v4 = vpop.permute.xlu1 %604  ;;  %v603_v5 = vpop.permute.xlu0 %602  ;;  %v1556_v30 = vpack.c.bf16 %v643_v23, %v639_v26  ;;  %3277 = vst [vmem:[#allocation19_spill] sm:$0xff] %v2605_v6  ;;  %3278 = vst [vmem:[#allocation20_spill] sm:$0xff] %v2608_v7 }
 0x142   : > { %v608_v34 = vsel %vm606_vm6, %v601_v22, %v605_v4  ;;  %v614_v35 = vsel %vm606_vm6, %v605_v4, %v593_v58  ;;  %v607_v39 = vsel %vm606_vm6, %v599_v0, %v603_v5  ;;  %v613_v40 = vsel %vm606_vm6, %v603_v5, %v591_v59 }
 0x143   : > { %v644_v42 = vmul.f32 %v2565_v1, %v608_v34  ;;  %v645_v43 = vmul.f32 %v2568_v3, %v614_v35  ;;  %v640_v44 = vmul.f32 %v2565_v1, %v607_v39  ;;  %v641_v47 = vmul.f32 %v2568_v3, %v613_v40  ;;  %1557 = vmatprep.subr.bf16.mxu0 %v1556_v30 }
 0x144   : > { %1559 = vmatpush1.bf16.msra.mxu0 %v1558_v31 }
 0x145   : > { %v649_v49 = vpop.permute.xlu1 %648  ;;  %v647_v50 = vpop.permute.xlu0 %646  ;;  %v1592_v51 = vpack.c.bf16 %v645_v43, %v641_v47  ;;  %v1594_v52 = vpack.c.bf16 %v644_v42, %v640_v44 }
 0x147   : > { %1593 = vmatprep.subr.bf16.mxu1 %v1592_v51 }
 0x148   : > { %1595 = vmatpush1.bf16.msra.mxu1 %v1594_v52  ;;  %v1516_v52 = vld [vmem:[%s3208_s1 + $0x20] sm:$0xf] }
 0x149   : > { %v653_v58 = vpop.permute.xlu1 %652  ;;  %v651_v59 = vpop.permute.xlu0 %650 }
 0x14a   : > { %v668_v60 = vsel %vm662_vm7, %v649_v49, %v653_v58  ;;  %v667_v61 = vsel %vm662_vm7, %v647_v50, %v651_v59 }
 0x14b   : > { %v698_v9 = vmul.f32 %v2587_v57, %v668_v60  ;;  %v694_v12 = vmul.f32 %v2587_v57, %v667_v61  ;;  %v2634_v61 = vrot.slane %v1516_v52, %v2306_v11  ;;  %v2648_v11 = vrot.slane %v1516_v52, %v2335_v25 }
 0x14d   : > { %v657_v13 = vpop.permute.xlu1 %656  ;;  %v655_v17 = vpop.permute.xlu0 %654  ;;  %v1562_v5 = vpack.c.bf16 %v698_v9, %v694_v12  ;;  %3280 = vst [vmem:[#allocation22_spill] sm:$0xff] %v2634_v61  ;;  %3282 = vst [vmem:[#allocation24_spill] sm:$0xff] %v2648_v11 }
 0x14e   : > { %v666_v19 = vsel %vm662_vm7, %v653_v58, %v657_v13  ;;  %v665_v21 = vsel %vm662_vm7, %v651_v59, %v655_v17 }
 0x14f   : > { %v699_v22 = vmul.f32 %v2594_v63, %v666_v19  ;;  %v695_v0 = vmul.f32 %v2594_v63, %v665_v21 }
 0x151   : > { %v661_v23 = vpop.permute.xlu1 %660  ;;  %v659_v26 = vpop.permute.xlu0 %658  ;;  %v1560_v4 = vpack.c.bf16 %v699_v22, %v695_v0  ;;  %v2645_v0 = vrot.slane %v1516_v52, %v2323_v20 }
 0x152   : > { %v664_v30 = vsel %vm662_vm7, %v657_v13, %v661_v23  ;;  %v670_v31 = vsel %vm662_vm7, %v661_v23, %v649_v49  ;;  %v663_v34 = vsel %vm662_vm7, %v655_v17, %v659_v26  ;;  %v669_v35 = vsel %vm662_vm7, %v659_v26, %v647_v50 }
 0x153   : > { %v700_v39 = vmul.f32 %v2605_v6, %v664_v30  ;;  %v701_v40 = vmul.f32 %v2608_v7, %v670_v31  ;;  %v696_v42 = vmul.f32 %v2605_v6, %v663_v34  ;;  %v697_v43 = vmul.f32 %v2608_v7, %v669_v35  ;;  %1561 = vmatprep.subr.bf16.mxu0 %v1560_v4 }
 0x154   : > { %1563 = vmatpush1.bf16.msra.mxu0 %v1562_v5  ;;  %v2627_v50 = vrot.slane %v1516_v52, %v2333_v24  ;;  %3281 = vst [vmem:[#allocation23_spill] sm:$0xff] %v2645_v0 }
 0x155   : > { %v705_v44 = vpop.permute.xlu1 %704  ;;  %v703_v47 = vpop.permute.xlu0 %702  ;;  %v1596_v51 = vpack.c.bf16 %v701_v40, %v697_v43  ;;  %v1598_v49 = vpack.c.bf16 %v700_v39, %v696_v42  ;;  %v758_v42 = vld [vmem:[#allocation5] sm:$0xff] }
 0x156   : > { %3279 = vst [vmem:[#allocation21_spill] sm:$0xff] %v2627_v50 }
 0x157   : > { %1597 = vmatprep.subr.bf16.mxu1 %v1596_v51 }
 0x158   : > { %1599 = vmatpush1.bf16.msra.mxu1 %v1598_v49 }
 0x159   : > { %v709_v53 = vpop.permute.xlu1 %708  ;;  %v707_v58 = vpop.permute.xlu0 %706 }
 0x15a   : > { %v724_v59 = vsel %vm718_vm8, %v705_v44, %v709_v53  ;;  %v723_v60 = vsel %vm718_vm8, %v703_v47, %v707_v58 }
 0x15b   : > { %v754_v9 = vmul.f32 %v2627_v50, %v724_v59  ;;  %v750_v12 = vmul.f32 %v2627_v50, %v723_v60 }
 0x15d   : > { %v713_v13 = vpop.permute.xlu1 %712  ;;  %v711_v17 = vpop.permute.xlu0 %710  ;;  %v1566_v5 = vpack.c.bf16 %v754_v9, %v750_v12 }
 0x15e   : > { %v722_v24 = vsel %vm718_vm8, %v709_v53, %v713_v13  ;;  %v721_v19 = vsel %vm718_vm8, %v707_v58, %v711_v17 }
 0x15f   : > { %v755_v21 = vmul.f32 %v2634_v61, %v722_v24  ;;  %v751_v22 = vmul.f32 %v2634_v61, %v721_v19 }
 0x161   : > { %v717_v23 = vpop.permute.xlu1 %716  ;;  %v715_v26 = vpop.permute.xlu0 %714  ;;  %v1564_v4 = vpack.c.bf16 %v755_v21, %v751_v22 }
 0x162   : > { %v720_v30 = vsel %vm718_vm8, %v713_v13, %v717_v23  ;;  %v726_v31 = vsel %vm718_vm8, %v717_v23, %v705_v44  ;;  %v719_v34 = vsel %vm718_vm8, %v711_v17, %v715_v26  ;;  %v725_v20 = vsel %vm718_vm8, %v715_v26, %v703_v47  ;;  %v761_v44 = vld [vmem:[#allocation5 + $0x18] sm:$0xff]  ;;  %v760_v47 = vld [vmem:[#allocation5 + $0x10] sm:$0xff] }
 0x163   : > { %v756_v35 = vmul.f32 %v2645_v0, %v720_v30  ;;  %v757_v25 = vmul.f32 %v2648_v11, %v726_v31  ;;  %v752_v39 = vmul.f32 %v2645_v0, %v719_v34  ;;  %v753_v40 = vmul.f32 %v2648_v11, %v725_v20  ;;  %1565 = vmatprep.subr.bf16.mxu0 %v1564_v4 }
 0x164   : > { %1567 = vmatpush1.bf16.msra.mxu0 %v1566_v5 }
 0x165   : > { %v1600_v43 = vpack.c.bf16 %v757_v25, %v753_v40  ;;  %v1602_v51 = vpack.c.bf16 %v756_v35, %v752_v39 }
 0x167   : > { %846 = vmatmul.mubr.f32.vlgmr.msra.gmra.mrb[0].mxu0 %v758_v42  ;;  %1601 = vmatprep.subr.bf16.mxu1 %v1600_v43 }
 0x168   : > { %1603 = vmatpush1.bf16.msra.mxu1 %v1602_v51  ;;  %1518 = vmatprep.mubr.msk.f32.mxu0 %vm774_vm0, %v761_v44 }
 0x16b   : > { %852 = vmatmul.mubr.f32.gmra.mrb[2].mxu0 %v760_v47  ;;  %923 = vmatmul.mubr.f32.vlgmr.msra.gmra.mrb[0].mxu1 %v758_v42 }
 0x16c   : > { %1520 = vmatprep.mubr.msk.f32.mxu1 %vm774_vm0, %v761_v44 }
 0x16f   : > { %929 = vmatmul.mubr.f32.gmra.mrb[2].mxu1 %v760_v47 }
 0x172   : > { %v767_v49 = vpop.permute.xlu0 %766 }
 0x173   : > { %v772_v59 = vpop.permute.xlu1 %771 }
 0x23a   : > { %v847_v52 = vpop.f32.mrb[0].mxu0 }
 0x23b   : > { %v848_v53 = vadd.f32 %v847_v52, %v767_v49  ;;  %v849_v58 = vpop.f32.mrb[1].mxu0 }
 0x23c   : > { %v850_v34 = vadd.f32 %v849_v58, %v767_v49  ;;  %v1203_v58 = vld [vmem:[%s3212_s5] sm:$0xff] }
 0x23d   : > { %v2664_v60 = vmax.f32 %v848_v53, 0.0 }
 0x23e   : > { %v853_v9 = vpop.f32.mrb[2].mxu0  ;;  %v924_v12 = vpop.f32.mrb[0].mxu1  ;;  %v2738_v20 = vmax.f32 %v850_v34, 0.0 }
 0x23f   : > { %v854_v13 = vadd.f32 %v853_v9, %v772_v59  ;;  %v925_v17 = vadd.f32 %v924_v12, %v767_v49  ;;  %v855_v24 = vpop.f32.mrb[3].mxu0  ;;  %v926_v19 = vpop.f32.mrb[1].mxu1  ;;  %943 = vrot.lane.b32.xlu1 %v2664_v60, %s1936_s8  ;;  %v1204_v12 = vld [vmem:[%s3212_s5 + $0x8] sm:$0xff] }
 0x240   : > { %v856_v35 = vadd.f32 %v855_v24, %v772_v59  ;;  %v927_v25 = vadd.f32 %v926_v19, %v767_v49  ;;  %v1200_v49 = vld [vmem:[#allocation7 + $0x8] sm:$0xff] }
 0x241   : > { %v2668_v21 = vmax.f32 %v854_v13, 0.0  ;;  %v2670_v22 = vmax.f32 %v925_v17, 0.0  ;;  %1521 = vmatprep.mubr.msk.f32.mxu0 %vm774_vm0, %v1200_v49  ;;  %1523 = vmatprep.mubr.msk.f32.mxu1 %vm774_vm0, %v1200_v49 }
 0x242   : > { %v930_v23 = vpop.f32.mrb[2].mxu1  ;;  %v2744_v39 = vmax.f32 %v856_v35, 0.0  ;;  %v2746_v40 = vmax.f32 %v927_v25, 0.0 }
 0x243   : > { %3283 = vst [vmem:[#allocation25_spill] sm:$0xff] %v2670_v22  ;;  %v931_v26 = vadd.f32 %v930_v23, %v772_v59  ;;  %v932_v4 = vpop.f32.mrb[3].mxu1  ;;  %945 = vrot.lane.b32.xlu0 %v2668_v21, %s1936_s8  ;;  %951 = vrot.lane.b32.xlu1 %v2670_v22, %s1936_s8 }
 0x244   : > { %v933_v42 = vadd.f32 %v932_v4, %v772_v59 }
 0x245   : > { %v2678_v30 = vmax.f32 %v931_v26, 0.0 }
 0x246   : > { %v2752_v43 = vmax.f32 %v933_v42, 0.0 }
 0x247   : > { %3284 = vst [vmem:[#allocation26_spill] sm:$0xff] %v2678_v30  ;;  %953 = vrot.lane.b32.xlu0 %v2678_v30, %s1936_s8  ;;  %975 = vrot.lane.b32.xlu1 %v2664_v60, %s1937_s11 }
 0x24b   : > { %977 = vrot.lane.b32.xlu0 %v2668_v21, %s1937_s11  ;;  %983 = vrot.lane.b32.xlu1 %v2670_v22, %s1937_s11 }
 0x24f   : > { %985 = vrot.lane.b32.xlu0 %v2678_v30, %s1937_s11  ;;  %1007 = vrot.lane.b32.xlu1 %v2664_v60, %s1938_s20 }
 0x253   : > { %1009 = vrot.lane.b32.xlu0 %v2668_v21, %s1938_s20  ;;  %1015 = vrot.lane.b32.xlu1 %v2670_v22, %s1938_s20 }
 0x257   : > { %1017 = vrot.lane.b32.xlu0 %v2678_v30, %s1938_s20  ;;  %1039 = vrot.lane.b32.xlu1 %v2664_v60, %s1939_s7 }
 0x25b   : > { %1041 = vrot.lane.b32.xlu0 %v2668_v21, %s1939_s7  ;;  %1047 = vrot.lane.b32.xlu1 %v2670_v22, %s1939_s7 }
 0x25f   : > { %1049 = vrot.lane.b32.xlu0 %v2678_v30, %s1939_s7  ;;  %1071 = vrot.lane.b32.xlu1 %v2664_v60, %s1940_s18 }
 0x263   : > { %1073 = vrot.lane.b32.xlu0 %v2668_v21, %s1940_s18  ;;  %1079 = vrot.lane.b32.xlu1 %v2670_v22, %s1940_s18 }
 0x267   : > { %1081 = vrot.lane.b32.xlu0 %v2678_v30, %s1940_s18  ;;  %1103 = vrot.lane.b32.xlu1 %v2664_v60, %s1941_s30 }
 0x26b   : > { %1105 = vrot.lane.b32.xlu0 %v2668_v21, %s1941_s30  ;;  %1111 = vrot.lane.b32.xlu1 %v2670_v22, %s1941_s30 }
 0x26f   : > { %1113 = vrot.lane.b32.xlu0 %v2678_v30, %s1941_s30  ;;  %1135 = vrot.lane.b32.xlu1 %v2664_v60, %s1942_s28 }
 0x273   : > { %1137 = vrot.lane.b32.xlu0 %v2668_v21, %s1942_s28  ;;  %1143 = vrot.lane.b32.xlu1 %v2670_v22, %s1942_s28 }
 0x277   : > { %1145 = vrot.lane.b32.xlu0 %v2678_v30, %s1942_s28  ;;  %1167 = vrot.lane.b32.xlu1 %v2664_v60, %s1943_s13 }
 0x27b   : > { %1169 = vrot.lane.b32.xlu0 %v2668_v21, %s1943_s13  ;;  %1175 = vrot.lane.b32.xlu1 %v2670_v22, %s1943_s13 }
 0x27f   : > { %1177 = vrot.lane.b32.xlu0 %v2678_v30, %s1943_s13  ;;  %947 = vrot.lane.b32.xlu1 %v2738_v20, %s1936_s8 }
 0x283   : > { %949 = vrot.lane.b32.xlu0 %v2744_v39, %s1936_s8  ;;  %955 = vrot.lane.b32.xlu1 %v2746_v40, %s1936_s8 }
 0x287   : > { %957 = vrot.lane.b32.xlu0 %v2752_v43, %s1936_s8  ;;  %979 = vrot.lane.b32.xlu1 %v2738_v20, %s1937_s11 }
 0x28b   : > { %981 = vrot.lane.b32.xlu0 %v2744_v39, %s1937_s11  ;;  %987 = vrot.lane.b32.xlu1 %v2746_v40, %s1937_s11 }
 0x28f   : > { %989 = vrot.lane.b32.xlu0 %v2752_v43, %s1937_s11  ;;  %1011 = vrot.lane.b32.xlu1 %v2738_v20, %s1938_s20 }
 0x293   : > { %1013 = vrot.lane.b32.xlu0 %v2744_v39, %s1938_s20  ;;  %1019 = vrot.lane.b32.xlu1 %v2746_v40, %s1938_s20 }
 0x297   : > { %1021 = vrot.lane.b32.xlu0 %v2752_v43, %s1938_s20  ;;  %1043 = vrot.lane.b32.xlu1 %v2738_v20, %s1939_s7 }
 0x29b   : > { %1045 = vrot.lane.b32.xlu0 %v2744_v39, %s1939_s7  ;;  %1051 = vrot.lane.b32.xlu1 %v2746_v40, %s1939_s7 }
 0x29f   : > { %1053 = vrot.lane.b32.xlu0 %v2752_v43, %s1939_s7  ;;  %1075 = vrot.lane.b32.xlu1 %v2738_v20, %s1940_s18 }
 0x2a3   : > { %1077 = vrot.lane.b32.xlu0 %v2744_v39, %s1940_s18  ;;  %1083 = vrot.lane.b32.xlu1 %v2746_v40, %s1940_s18 }
 0x2a7   : > { %1085 = vrot.lane.b32.xlu0 %v2752_v43, %s1940_s18  ;;  %1107 = vrot.lane.b32.xlu1 %v2738_v20, %s1941_s30  ;;  %s3140_s18 = scalar_lea.vmem [#allocation8], %s1506_s29  ;;  %s1531_s29 = sshll.u32 %s2005_s25, 9 }
 0x2a8   : > { %s3160_s25 = scalar_lea.hbm %s3213_s6, %s1531_s29 }
 0x2ab   : > { %1109 = vrot.lane.b32.xlu0 %v2744_v39, %s1941_s30  ;;  %1115 = vrot.lane.b32.xlu1 %v2746_v40, %s1941_s30 }
 0x2af   : > { %1117 = vrot.lane.b32.xlu0 %v2752_v43, %s1941_s30  ;;  %1139 = vrot.lane.b32.xlu1 %v2738_v20, %s1942_s28  ;;  %s1405_s30 = sshll.u32 %s3140_s18, 4  ;;  %s3152_s30 = int_to_ptr.vmem [resolvable:$true] %s1405_s30 }
 0x2b0   : > { %s1856_s19 = scalar_lea.vmem %s3152_s30, 1024  ;;  %p1863_p0 = scmp.lt.s32.totalorder %s3152_s30, %s1861_s15 }
 0x2b1   : > { %v944_v51 = vpop.permute.xlu1 %943  ;;  %p1857_p3 = scmp.ne.s32.totalorder %s3152_s30, %s1856_s19  ;;  %p1864_p7 = scmp.lt.s32.totalorder %s1862_s12, %s1856_s19 }
 0x2b3   : > { %1141 = vrot.lane.b32.xlu0 %v2744_v39, %s1942_s28  ;;  %1147 = vrot.lane.b32.xlu1 %v2746_v40, %s1942_s28  ;;  %p1858_p10 = pnand %p1857_p3, %p3323_p9  ;;  %p1865_p2 = por %p1864_p7, %p1863_p0 }
 0x2b5   : > { %v946_v44 = vpop.permute.xlu0 %945  ;;  %v952_v47 = vpop.permute.xlu1 %951  ;;  %p1859_p1 = pneg %p1858_p10 }
 0x2b7   : > { %1149 = vrot.lane.b32.xlu0 %v2752_v43, %s1942_s28  ;;  %1171 = vrot.lane.b32.xlu1 %v2738_v20, %s1943_s13  ;;  %p1866_p5 = pnand %p1865_p2, %p1859_p1 }
 0x2b9   : > { %v954_v52 = vpop.permute.xlu0 %953  ;;  %v2808_v53 = vpop.permute.xlu1 %975 }
 0x2bb   : > { %1173 = vrot.lane.b32.xlu0 %v2744_v39, %s1943_s13  ;;  %1179 = vrot.lane.b32.xlu1 %v2746_v40, %s1943_s13 }
 0x2bd   : > { %v2817_v59 = vpop.permute.xlu0 %977  ;;  %v2819_v9 = vpop.permute.xlu1 %983 }
 0x2bf   : > { %1181 = vrot.lane.b32.xlu0 %v2752_v43, %s1943_s13  ;;  %1207 = vperm.xlu1 %1761, %v1203_v58  }
 0x2c1   : > { %v2826_v13 = vpop.permute.xlu0 %985  ;;  %v2828_v17 = vpop.permute.xlu1 %1007 }
 0x2c3   : > { %1212 = vperm.xlu0 %1760, %v1204_v12  }
 0x2c5   : > { %v2830_v24 = vpop.permute.xlu0 %1009  ;;  %v2832_v19 = vpop.permute.xlu1 %1015 }
 0x2c9   : > { %v2834_v23 = vpop.permute.xlu0 %1017  ;;  %v2836_v26 = vpop.permute.xlu1 %1039 }
 0x2cd   : > { %v2838_v4 = vpop.permute.xlu0 %1041  ;;  %v2840_v34 = vpop.permute.xlu1 %1047 }
 0x2d1   : > { %v2842_v35 = vpop.permute.xlu0 %1049  ;;  %v2844_v25 = vpop.permute.xlu1 %1071 }
 0x2d5   : > { %v2846_v42 = vpop.permute.xlu0 %1073  ;;  %v2848_v49 = vpop.permute.xlu1 %1079 }
 0x2d9   : > { %v2850_v58 = vpop.permute.xlu0 %1081  ;;  %v2852_v12 = vpop.permute.xlu1 %1103 }
 0x2da   : > { %3285 = vst [vmem:[#allocation27_spill] sm:$0xff] %v2852_v12 }
 0x2dd   : > { %v2854_v31 = vpop.permute.xlu0 %1105  ;;  %v2856_v5 = vpop.permute.xlu1 %1111 }
 0x2de   : > { %3286 = vst [vmem:[#allocation28_spill] sm:$0xff] %v2854_v31 }
 0x2e1   : > { %v2858_v11 = vpop.permute.xlu0 %1113  ;;  %v2860_v0 = vpop.permute.xlu1 %1135 }
 0x2e2   : > { %3287 = vst [vmem:[#allocation29_spill] sm:$0xff] %v2858_v11  ;;  %3288 = vst [vmem:[#allocation30_spill] sm:$0xff] %v2860_v0 }
 0x2e5   : > { %v2862_v61 = vpop.permute.xlu0 %1137  ;;  %v2864_v50 = vpop.permute.xlu1 %1143 }
 0x2e6   : > { %3289 = vst [vmem:[#allocation31_spill] sm:$0xff] %v2862_v61  ;;  %3290 = vst [vmem:[#allocation32_spill] sm:$0xff] %v2864_v50 }
 0x2e9   : > { %v2866_v7 = vpop.permute.xlu0 %1145  ;;  %v2868_v6 = vpop.permute.xlu1 %1167 }
 0x2ea   : > { %3291 = vst [vmem:[#allocation33_spill] sm:$0xff] %v2866_v7  ;;  %3292 = vst [vmem:[#allocation34_spill] sm:$0xff] %v2868_v6 }
 0x2ed   : > { %v2870_v63 = vpop.permute.xlu0 %1169  ;;  %v2872_v57 = vpop.permute.xlu1 %1175 }
 0x2ee   : > { %3293 = vst [vmem:[#allocation35_spill] sm:$0xff] %v2870_v63  ;;  %3294 = vst [vmem:[#allocation36_spill] sm:$0xff] %v2872_v57 }
 0x2f1   : > { %v2874_v3 = vpop.permute.xlu0 %1177  ;;  %v948_v1 = vpop.permute.xlu1 %947 }
 0x2f2   : > { %3295 = vst [vmem:[#allocation37_spill] sm:$0xff] %v2874_v3  ;;  %v961_v18 = vsel %vm327_vm1, %v948_v1, %v952_v47  ;;  %v963_v0 = vsel %vm327_vm1, %v944_v51, %v948_v1 }
 0x2f3   : > { %v968_v63 = vmul.f32 %v963_v0, %v2319_v16  ;;  %v969_v57 = vmul.f32 %v961_v18, %v2338_v29 }
 0x2f5   : > { %v950_v61 = vpop.permute.xlu0 %949  ;;  %v956_v8 = vpop.permute.xlu1 %955 }
 0x2f6   : > { %v962_v7 = vsel %vm327_vm1, %v950_v61, %v954_v52  ;;  %v964_v6 = vsel %vm327_vm1, %v946_v44, %v950_v61  ;;  %v959_v31 = vsel %vm327_vm1, %v952_v47, %v956_v8  ;;  %v965_v1 = vsel %vm327_vm1, %v956_v8, %v944_v51 }
 0x2f7   : > { %v972_v3 = vmul.f32 %v964_v6, %v2319_v16  ;;  %v973_v50 = vmul.f32 %v962_v7, %v2338_v29  ;;  %v967_v16 = vmul.f32 %v965_v1, %v2349_v32  ;;  %v970_v29 = vmul.f32 %v959_v31, %v2352_v33 }
 0x2f9   : > { %v1642_v11 = vpack.c.bf16 %v973_v50, %v969_v57  ;;  %v958_v22 = vpop.permute.xlu0 %957  ;;  %v980_v30 = vpop.permute.xlu1 %979  ;;  %v1604_v12 = vpack.c.bf16 %v972_v3, %v968_v63 }
 0x2fa   : > { %v960_v61 = vsel %vm327_vm1, %v954_v52, %v958_v22  ;;  %v966_v18 = vsel %vm327_vm1, %v958_v22, %v946_v44  ;;  %v993_v8 = vsel %vm382_vm2, %v980_v30, %v2819_v9  ;;  %v995_v3 = vsel %vm382_vm2, %v2808_v53, %v980_v30 }
 0x2fb   : > { %v971_v6 = vmul.f32 %v966_v18, %v2349_v32  ;;  %v974_v7 = vmul.f32 %v960_v61, %v2352_v33  ;;  %1605 = vmatprep.subr.bf16.mxu0 %v1604_v12  ;;  %v1000_v33 = vmul.f32 %v995_v3, %v2379_v55  ;;  %v1001_v31 = vmul.f32 %v993_v8, %v2388_v62 }
 0x2fd   : > { %v1606_v57 = vpack.c.bf16 %v971_v6, %v967_v16  ;;  %v982_v63 = vpop.permute.xlu0 %981  ;;  %v988_v50 = vpop.permute.xlu1 %987  ;;  %v1640_v0 = vpack.c.bf16 %v974_v7, %v970_v29 }
 0x2fe   : > { %v994_v22 = vsel %vm382_vm2, %v982_v63, %v2826_v13  ;;  %v996_v32 = vsel %vm382_vm2, %v2817_v59, %v982_v63  ;;  %v991_v44 = vsel %vm382_vm2, %v2819_v9, %v988_v50  ;;  %v997_v47 = vsel %vm382_vm2, %v988_v50, %v2808_v53 }
 0x2ff   : > { %v1004_v51 = vmul.f32 %v996_v32, %v2379_v55  ;;  %v1005_v30 = vmul.f32 %v994_v22, %v2388_v62  ;;  %1607 = vmatpush1.bf16.msra.mxu0 %v1606_v57  ;;  %1641 = vmatprep.subr.bf16.mxu1 %v1640_v0  ;;  %v999_v9 = vmul.f32 %v997_v47, %v2395_v14 }
 0x300   : > { %1643 = vmatpush1.bf16.msra.mxu1 %v1642_v11  ;;  %v1002_v18 = vmul.f32 %v991_v44, %v2398_v15 }
 0x301   : > { %v1646_v52 = vpack.c.bf16 %v1005_v30, %v1001_v31  ;;  %v990_v12 = vpop.permute.xlu0 %989  ;;  %v1012_v1 = vpop.permute.xlu1 %1011  ;;  %v1608_v61 = vpack.c.bf16 %v1004_v51, %v1000_v33 }
 0x302   : > { %v992_v55 = vsel %vm382_vm2, %v2826_v13, %v990_v12  ;;  %v998_v62 = vsel %vm382_vm2, %v990_v12, %v2817_v59  ;;  %v1025_v11 = vsel %vm438_vm3, %v1012_v1, %v2832_v19  ;;  %v1027_v13 = vsel %vm438_vm3, %v2828_v17, %v1012_v1 }
 0x303   : > { %v1003_v53 = vmul.f32 %v998_v62, %v2395_v14  ;;  %v1006_v16 = vmul.f32 %v992_v55, %v2398_v15  ;;  %1609 = vmatprep.subr.bf16.mxu0 %v1608_v61  ;;  %v1032_v15 = vmul.f32 %v1027_v13, %v2419_v41  ;;  %v1033_v3 = vmul.f32 %v1025_v11, %v2428_v48 }
 0x305   : > { %v1610_v29 = vpack.c.bf16 %v1003_v53, %v999_v9  ;;  %v1014_v6 = vpop.permute.xlu0 %1013  ;;  %v1020_v59 = vpop.permute.xlu1 %1019  ;;  %v1644_v7 = vpack.c.bf16 %v1006_v16, %v1002_v18 }
 0x306   : > { %v1026_v8 = vsel %vm438_vm3, %v1014_v6, %v2834_v23  ;;  %v1028_v14 = vsel %vm438_vm3, %v2830_v24, %v1014_v6  ;;  %v1023_v50 = vsel %vm438_vm3, %v2832_v19, %v1020_v59  ;;  %v1029_v0 = vsel %vm438_vm3, %v1020_v59, %v2828_v17 }
 0x307   : > { %v1036_v57 = vmul.f32 %v1028_v14, %v2419_v41  ;;  %v1037_v63 = vmul.f32 %v1026_v8, %v2428_v48  ;;  %1611 = vmatpush1.bf16.msra.mxu0 %v1610_v29  ;;  %1645 = vmatprep.subr.bf16.mxu1 %v1644_v7  ;;  %v1031_v19 = vmul.f32 %v1029_v0, %v2435_v54 }
 0x308   : > { %1647 = vmatpush1.bf16.msra.mxu1 %v1646_v52  ;;  %v1034_v51 = vmul.f32 %v1023_v50, %v2438_v56 }
 0x309   : > { %v1650_v22 = vpack.c.bf16 %v1037_v63, %v1033_v3  ;;  %v1022_v32 = vpop.permute.xlu0 %1021  ;;  %v1044_v33 = vpop.permute.xlu1 %1043  ;;  %v1612_v31 = vpack.c.bf16 %v1036_v57, %v1032_v15 }
 0x30a   : > { %v1024_v41 = vsel %vm438_vm3, %v2834_v23, %v1022_v32  ;;  %v1030_v48 = vsel %vm438_vm3, %v1022_v32, %v2830_v24  ;;  %v1057_v44 = vsel %vm494_vm4, %v1044_v33, %v2840_v34  ;;  %v1059_v23 = vsel %vm494_vm4, %v2836_v26, %v1044_v33 }
 0x30b   : > { %v1035_v17 = vmul.f32 %v1030_v48, %v2435_v54  ;;  %v1038_v30 = vmul.f32 %v1024_v41, %v2438_v56  ;;  %1613 = vmatprep.subr.bf16.mxu0 %v1612_v31  ;;  %v1064_v56 = vmul.f32 %v1059_v23, %v2459_v28  ;;  %v1065_v61 = vmul.f32 %v1057_v44, %v2468_v38  ;;  %v3297_v41 = vld [vmem:[#allocation27_spill] sm:$0xff]  ;;  %v3302_v23 = vld [vmem:[#allocation28_spill] sm:$0xff] }
 0x30d   : > { %v1614_v47 = vpack.c.bf16 %v1035_v17, %v1031_v19  ;;  %v1046_v52 = vpop.permute.xlu0 %1045  ;;  %v1052_v24 = vpop.permute.xlu1 %1051  ;;  %v1648_v12 = vpack.c.bf16 %v1038_v30, %v1034_v51  ;;  %v3298_v51 = vld [vmem:[#allocation26_spill] sm:$0xff]  ;;  %v3299_v17 = vld [vmem:[#allocation25_spill] sm:$0xff] }
 0x30e   : > { %v1058_v1 = vsel %vm494_vm4, %v1046_v52, %v2842_v35  ;;  %v1060_v54 = vsel %vm494_vm4, %v2838_v4, %v1046_v52  ;;  %v1055_v9 = vsel %vm494_vm4, %v2840_v34, %v1052_v24  ;;  %v1061_v18 = vsel %vm494_vm4, %v1052_v24, %v2836_v26  ;;  %v3303_v52 = vld [vmem:[#allocation13_spill] sm:$0xff] }
 0x30f   : > { %v1068_v55 = vmul.f32 %v1060_v54, %v2459_v28  ;;  %v1069_v62 = vmul.f32 %v1058_v1, %v2468_v38  ;;  %1615 = vmatpush1.bf16.msra.mxu0 %v1614_v47  ;;  %1649 = vmatprep.subr.bf16.mxu1 %v1648_v12  ;;  %v1063_v34 = vmul.f32 %v1061_v18, %v2475_v45  ;;  %v3304_v12 = vld [vmem:[#allocation14_spill] sm:$0xff] }
 0x310   : > { %1651 = vmatpush1.bf16.msra.mxu1 %v1650_v22  ;;  %v1066_v29 = vmul.f32 %v1055_v9, %v2478_v46 }
 0x311   : > { %v1654_v53 = vpack.c.bf16 %v1069_v62, %v1065_v61  ;;  %v1054_v16 = vpop.permute.xlu0 %1053  ;;  %v1076_v11 = vpop.permute.xlu1 %1075  ;;  %v1616_v13 = vpack.c.bf16 %v1068_v55, %v1064_v56 }
 0x312   : > { %v1056_v28 = vsel %vm494_vm4, %v2842_v35, %v1054_v16  ;;  %v1062_v38 = vsel %vm494_vm4, %v1054_v16, %v2838_v4  ;;  %v1089_v59 = vsel %vm550_vm5, %v1076_v11, %v2848_v49 }
 0x313   : > { %v1067_v26 = vmul.f32 %v1062_v38, %v2475_v45  ;;  %v1070_v6 = vmul.f32 %v1056_v28, %v2478_v46  ;;  %1617 = vmatprep.subr.bf16.mxu0 %v1616_v13  ;;  %v1620_v45 = vpack.c.bf16 %v2744_v39, %v2738_v20  ;;  %v1091_v46 = vsel %vm550_vm5, %v2844_v25, %v1076_v11  ;;  %v3305_v13 = vld [vmem:[#allocation15_spill] sm:$0xff]  ;;  %v3306_v28 = vld [vmem:[#allocation16_spill] sm:$0xff] }
 0x314   : > { %v1096_v3 = vmul.f32 %v1089_v59, %v2514_v27  ;;  %v1656_v20 = vpack.c.bf16 %v2752_v43, %v2746_v40  ;;  %v1095_v32 = vmul.f32 %v1091_v46, %v2507_v2  ;;  %v3308_v59 = vld [vmem:[#allocation30_spill] sm:$0xff]  ;;  %v3310_v46 = vld [vmem:[#allocation31_spill] sm:$0xff] }
 0x315   : > { %v1618_v7 = vpack.c.bf16 %v1067_v26, %v1063_v34  ;;  %v1078_v8 = vpop.permute.xlu0 %1077  ;;  %v1084_v35 = vpop.permute.xlu1 %1083  ;;  %v1652_v14 = vpack.c.bf16 %v1070_v6, %v1066_v29  ;;  %v3307_v26 = vld [vmem:[#allocation32_spill] sm:$0xff] }
 0x316   : > { %v1090_v4 = vsel %vm550_vm5, %v1078_v8, %v2850_v58  ;;  %v1092_v15 = vsel %vm550_vm5, %v2846_v42, %v1078_v8  ;;  %v1087_v63 = vsel %vm550_vm5, %v2848_v49, %v1084_v35  ;;  %v1093_v50 = vsel %vm550_vm5, %v1084_v35, %v2844_v25 }
 0x317   : > { %v1100_v57 = vmul.f32 %v1090_v4, %v2514_v27  ;;  %1619 = vmatpush1.bf16.msra.mxu0 %v1618_v7  ;;  %1653 = vmatprep.subr.bf16.mxu1 %v1652_v14  ;;  %v1099_v39 = vmul.f32 %v1092_v15, %v2507_v2  ;;  %v1097_v33 = vmul.f32 %v1087_v63, %v2525_v36  ;;  %v3309_v15 = vld [vmem:[#allocation33_spill] sm:$0xff] }
 0x318   : > { %1621 = vmatprep.subr.bf16.mxu0 %v1620_v45  ;;  %1655 = vmatpush1.bf16.msra.mxu1 %v1654_v53  ;;  %v1098_v40 = vmul.f32 %v1093_v50, %v2528_v37  ;;  %v3296_v2 = vpack.c.bf16 %v2668_v21, %v2664_v60  ;;  %v3301_v60 = vld [vmem:[#allocation29_spill] sm:$0xff]  ;;  %v3312_v50 = vld [vmem:[#allocation18_spill] sm:$0xff] }
 0x319   : > { %v1086_v0 = vpop.permute.xlu0 %1085  ;;  %v1108_v22 = vpop.permute.xlu1 %1107  ;;  %v1624_v27 = vpack.c.bf16 %v1100_v57, %v1096_v3  ;;  %1657 = vmatprep.subr.bf16.mxu1 %v1656_v20  ;;  %v1626_v48 = vpack.c.bf16 %v1099_v39, %v1095_v32  ;;  %v3311_v57 = vld [vmem:[#allocation17_spill] sm:$0xff] }
 0x31a   : > { %v1088_v49 = vsel %vm550_vm5, %v2850_v58, %v1086_v0  ;;  %v1094_v25 = vsel %vm550_vm5, %v1086_v0, %v2846_v42  ;;  %v1121_v58 = vsel %vm606_vm6, %v1108_v22, %v2856_v5  ;;  %v1123_v42 = vsel %vm606_vm6, %v3297_v41, %v1108_v22 }
 0x31b   : > { %v1101_v43 = vmul.f32 %v1088_v49, %v2525_v36  ;;  %v1102_v31 = vmul.f32 %v1094_v25, %v2528_v37  ;;  %1623 = vmatpush1.bf16.msra.mxu0 %v3296_v2  ;;  %v3300_v36 = vpack.c.bf16 %v3298_v51, %v3299_v17  ;;  %v1127_v24 = vmul.f32 %v1123_v42, %v3303_v52  ;;  %v3316_v17 = vld [vmem:[#allocation34_spill] sm:$0xff] }
 0x31c   : > { %1625 = vmatprep.subr.bf16.mxu0 %v1624_v27  ;;  %v1128_v1 = vmul.f32 %v1121_v58, %v3304_v12  ;;  %v3314_v58 = vld [vmem:[#allocation20_spill] sm:$0xff] }
 0x31d   : > { %v1662_v19 = vpack.c.bf16 %v1101_v43, %v1097_v33  ;;  %1659 = vmatpush1.bf16.msra.mxu1 %v3300_v36  ;;  %v1110_v37 = vpop.permute.xlu0 %1109  ;;  %v1116_v30 = vpop.permute.xlu1 %1115  ;;  %v1660_v44 = vpack.c.bf16 %v1102_v31, %v1098_v40  ;;  %v3313_v31 = vld [vmem:[#allocation19_spill] sm:$0xff] }
 0x31e   : > { %v1122_v21 = vsel %vm606_vm6, %v1110_v37, %v3301_v60  ;;  %v1124_v47 = vsel %vm606_vm6, %v3302_v23, %v1110_v37  ;;  %v1119_v61 = vsel %vm606_vm6, %v2856_v5, %v1116_v30  ;;  %v1125_v55 = vsel %vm606_vm6, %v1116_v30, %v3297_v41 }
 0x31f   : > { %v1131_v54 = vmul.f32 %v1124_v47, %v3303_v52  ;;  %v1132_v56 = vmul.f32 %v1122_v21, %v3304_v12  ;;  %1627 = vmatpush1.bf16.msra.mxu0 %v1626_v48  ;;  %1661 = vmatprep.subr.bf16.mxu1 %v1660_v44  ;;  %v1129_v5 = vmul.f32 %v1119_v61, %v3305_v13  ;;  %v3317_v21 = vld [vmem:[#allocation37_spill] sm:$0xff]  ;;  %v3318_v47 = vld [vmem:[#allocation35_spill] sm:$0xff] }
 0x320   : > { %v1130_v38 = vmul.f32 %v1125_v55, %v3306_v28 }
 0x321   : > { %v1630_v62 = vpack.c.bf16 %v1131_v54, %v1127_v24  ;;  %1663 = vmatpush1.bf16.msra.mxu1 %v1662_v19  ;;  %v1118_v9 = vpop.permute.xlu0 %1117  ;;  %v1140_v18 = vpop.permute.xlu1 %1139  ;;  %v1628_v53 = vpack.c.bf16 %v1132_v56, %v1128_v1  ;;  %v3315_v19 = vld [vmem:[#allocation36_spill] sm:$0xff]  ;;  %v3319_v24 = vld [vmem:[#allocation21_spill] sm:$0xff]  ;;  %v3320_v1 = vld [vmem:[#allocation22_spill] sm:$0xff] }
 0x322   : > { %v1120_v16 = vsel %vm606_vm6, %v3301_v60, %v1118_v9  ;;  %v1126_v11 = vsel %vm606_vm6, %v1118_v9, %v3302_v23  ;;  %v1153_v6 = vsel %vm662_vm7, %v1140_v18, %v3307_v26  ;;  %v1155_v7 = vsel %vm662_vm7, %v3308_v59, %v1140_v18 }
 0x323   : > { %v1133_v34 = vmul.f32 %v1120_v16, %v3305_v13  ;;  %v1134_v29 = vmul.f32 %v1126_v11, %v3306_v28  ;;  %1629 = vmatprep.subr.bf16.mxu0 %v1628_v53  ;;  %v1159_v63 = vmul.f32 %v1155_v7, %v3311_v57  ;;  %v1160_v20 = vmul.f32 %v1153_v6, %v3312_v50  ;;  %v3321_v13 = vld [vmem:[#allocation23_spill] sm:$0xff]  ;;  %v3322_v28 = vld [vmem:[#allocation24_spill] sm:$0xff] }
 0x324   : > { %1631 = vmatpush1.bf16.msra.mxu0 %v1630_v62  ;;  %v1202_v7 = vld [vmem:[#allocation7 + $0x18] sm:$0xff] }
 0x325   : > { %v1666_v8 = vpack.c.bf16 %v1133_v34, %v1129_v5  ;;  %v1142_v35 = vpop.permute.xlu0 %1141  ;;  %v1148_v14 = vpop.permute.xlu1 %1147  ;;  %v1664_v4 = vpack.c.bf16 %v1134_v29, %v1130_v38 }
 0x326   : > { %v1154_v45 = vsel %vm662_vm7, %v1142_v35, %v3309_v15  ;;  %v1156_v3 = vsel %vm662_vm7, %v3310_v46, %v1142_v35  ;;  %v1151_v22 = vsel %vm662_vm7, %v3307_v26, %v1148_v14  ;;  %v1157_v27 = vsel %vm662_vm7, %v1148_v14, %v3308_v59  ;;  %v1199_v26 = vld [vmem:[#allocation7] sm:$0xff] }
 0x327   : > { %v1163_v39 = vmul.f32 %v1156_v3, %v3311_v57  ;;  %v1164_v0 = vmul.f32 %v1154_v45, %v3312_v50  ;;  %1665 = vmatprep.subr.bf16.mxu1 %v1664_v4  ;;  %v1161_v2 = vmul.f32 %v1151_v22, %v3313_v31  ;;  %v1162_v41 = vmul.f32 %v1157_v27, %v3314_v58  ;;  %v1763_v57 = vld [vmem:[%s2154_s26 + $0x8] sm:$0xff] }
 0x328   : > { %1667 = vmatpush1.bf16.msra.mxu1 %v1666_v8 }
 0x329   : > { %v1634_v32 = vpack.c.bf16 %v1163_v39, %v1159_v63  ;;  %v1150_v49 = vpop.permute.xlu0 %1149  ;;  %v1172_v25 = vpop.permute.xlu1 %1171  ;;  %v1632_v33 = vpack.c.bf16 %v1164_v0, %v1160_v20 }
 0x32a   : > { %v1152_v40 = vsel %vm662_vm7, %v3309_v15, %v1150_v49  ;;  %v1158_v43 = vsel %vm662_vm7, %v1150_v49, %v3310_v46  ;;  %v1185_v51 = vsel %vm718_vm8, %v1172_v25, %v3315_v19  ;;  %v1187_v36 = vsel %vm718_vm8, %v3316_v17, %v1172_v25  ;;  %v1762_v46 = vld [vmem:[%s2154_s26] sm:$0xff] }
 0x32b   : > { %v1165_v42 = vmul.f32 %v1152_v40, %v3313_v31  ;;  %v1166_v48 = vmul.f32 %v1158_v43, %v3314_v58  ;;  %1633 = vmatprep.subr.bf16.mxu0 %v1632_v33  ;;  %v1191_v12 = vmul.f32 %v1187_v36, %v3319_v24  ;;  %v1192_v54 = vmul.f32 %v1185_v51, %v3320_v1  ;;  %v1764_v25 = vld [vmem:[%s2154_s26 + $0x20] sm:$0xff]  ;;  %v1765_v40 = vld [vmem:[%s2154_s26 + $0x10] sm:$0xff]  ;;  %v1766_v31 = vld [vmem:[%s2154_s26 + $0x28] sm:$0xff] }
 0x32c   : > { %1635 = vmatpush1.bf16.msra.mxu0 %v1634_v32  ;;  %v1767_v58 = vld [vmem:[%s2154_s26 + $0x18] sm:$0xff] }
 0x32d   : > { %v1670_v37 = vpack.c.bf16 %v1165_v42, %v1161_v2  ;;  %v1174_v30 = vpop.permute.xlu0 %1173  ;;  %v1180_v44 = vpop.permute.xlu1 %1179  ;;  %v1668_v60 = vpack.c.bf16 %v1166_v48, %v1162_v41 }
 0x32e   : > { %v1186_v23 = vsel %vm718_vm8, %v1174_v30, %v3317_v21  ;;  %v1188_v52 = vsel %vm718_vm8, %v3318_v47, %v1174_v30  ;;  %v1183_v55 = vsel %vm718_vm8, %v3315_v19, %v1180_v44  ;;  %v1189_v62 = vsel %vm718_vm8, %v1180_v44, %v3316_v17  ;;  %v1768_v17 = vld [vmem:[%s2154_s26 + $0x30] sm:$0xff] }
 0x32f   : > { %v1195_v56 = vmul.f32 %v1188_v52, %v3319_v24  ;;  %v1196_v61 = vmul.f32 %v1186_v23, %v3320_v1  ;;  %1669 = vmatprep.subr.bf16.mxu1 %v1668_v60  ;;  %v1193_v5 = vmul.f32 %v1183_v55, %v3321_v13  ;;  %v1194_v38 = vmul.f32 %v1189_v62, %v3322_v28 }
 0x330   : > { %1671 = vmatpush1.bf16.msra.mxu1 %v1670_v37  ;;  %v1769_v37 = vld [vmem:[%s2154_s26 + $0x38] sm:$0xff] }
 0x331   : > { %v1638_v9 = vpack.c.bf16 %v1195_v56, %v1191_v12  ;;  %v1182_v18 = vpop.permute.xlu0 %1181  ;;  %v1636_v53 = vpack.c.bf16 %v1196_v61, %v1192_v54 }
 0x332   : > { %v1184_v16 = vsel %vm718_vm8, %v3317_v21, %v1182_v18  ;;  %v1190_v11 = vsel %vm718_vm8, %v1182_v18, %v3318_v47 }
 0x333   : > { %v1197_v34 = vmul.f32 %v1184_v16, %v3321_v13  ;;  %v1198_v29 = vmul.f32 %v1190_v11, %v3322_v28  ;;  %1637 = vmatprep.subr.bf16.mxu0 %v1636_v53 }
 0x334   : > { %1639 = vmatpush1.bf16.msra.mxu0 %v1638_v9 }
 0x335   : > { %v1674_v6 = vpack.c.bf16 %v1197_v34, %v1193_v5  ;;  %v1672_v59 = vpack.c.bf16 %v1198_v29, %v1194_v38 }
 0x337   : > { %1286 = vmatmul.mubr.f32.vlgmr.msra.gmra.mrb[4].mxu0 %v1199_v26  ;;  %1673 = vmatprep.subr.bf16.mxu1 %v1672_v59 }
 0x338   : > { %1675 = vmatpush1.bf16.msra.mxu1 %v1674_v6  ;;  %1522 = vmatprep.mubr.msk.f32.mxu0 %vm774_vm0, %v1202_v7 }
 0x33b   : > { %1292 = vmatmul.mubr.f32.gmra.mrb[6].mxu0 %v1201_v10  ;;  %1363 = vmatmul.mubr.f32.vlgmr.msra.gmra.mrb[4].mxu1 %v1199_v26 }
 0x33c   : > { %1524 = vmatprep.mubr.msk.f32.mxu1 %vm774_vm0, %v1202_v7 }
 0x33e   : > { %v1208_v8 = vpop.permute.xlu1 %1207 }
 0x33f   : > { %1369 = vmatmul.mubr.f32.gmra.mrb[6].mxu1 %v1201_v10 }
 0x342   : > { %v1213_v45 = vpop.permute.xlu0 %1212 }
 0x40a   : > { %v1287_v35 = vpop.f32.mrb[4].mxu0 }
 0x40b   : > { %v1288_v14 = vadd.f32 %v1287_v35, %v1208_v8  ;;  %v1289_v4 = vpop.f32.mrb[5].mxu0 }
 0x40c   : > { %v1290_v15 = vadd.f32 %v1289_v4, %v1208_v8 }
 0x40d   : > { %v1375_v3 = vadd.f32 %v1762_v46, %v1288_v14 }
 0x40e   : > { %v1376_v63 = vadd.f32 %v1763_v57, %v1290_v15  ;;  %v1293_v50 = vpop.f32.mrb[6].mxu0  ;;  %v1364_v20 = vpop.f32.mrb[4].mxu1 }
 0x40f   : > { %1383 = vst [vmem:[%s3140_s18] sm:$0xff] %v1375_v3  ;;  %v1294_v39 = vadd.f32 %v1293_v50, %v1213_v45  ;;  %v1365_v0 = vadd.f32 %v1364_v20, %v1208_v8  ;;  %v1295_v22 = vpop.f32.mrb[7].mxu0  ;;  %v1366_v27 = vpop.f32.mrb[5].mxu1 }
 0x410   : > { %1384 = vst [vmem:[%s3140_s18 + $0x8] sm:$0xff] %v1376_v63  ;;  %v1296_v32 = vadd.f32 %v1295_v22, %v1213_v45  ;;  %v1367_v49 = vadd.f32 %v1366_v27, %v1208_v8 }
 0x411   : > { %v1379_v33 = vadd.f32 %v1764_v25, %v1294_v39  ;;  %v1377_v43 = vadd.f32 %v1765_v40, %v1365_v0 }
 0x412   : > { %v1380_v2 = vadd.f32 %v1766_v31, %v1296_v32  ;;  %v1378_v41 = vadd.f32 %v1767_v58, %v1367_v49  ;;  %v1370_v42 = vpop.f32.mrb[6].mxu1 }
 0x413   : > { %1387 = vst [vmem:[%s3140_s18 + $0x20] sm:$0xff] %v1379_v33  ;;  %1385 = vst [vmem:[%s3140_s18 + $0x10] sm:$0xff] %v1377_v43  ;;  %v1371_v48 = vadd.f32 %v1370_v42, %v1213_v45  ;;  %v1372_v19 = vpop.f32.mrb[7].mxu1 }
 0x414   : > { %1388 = vst [vmem:[%s3140_s18 + $0x28] sm:$0xff] %v1380_v2  ;;  %1386 = vst [vmem:[%s3140_s18 + $0x18] sm:$0xff] %v1378_v41  ;;  %v1373_v51 = vadd.f32 %v1372_v19, %v1213_v45 }
 0x415   : > { %v1381_v36 = vadd.f32 %v1768_v17, %v1371_v48 }
 0x416   : > { %v1382_v30 = vadd.f32 %v1769_v37, %v1373_v51 }
 0x417   : > { %1389 = vst [vmem:[%s3140_s18 + $0x30] sm:$0xff] %v1381_v36 }
 0x418   : > { %1390 = vst [vmem:[%s3140_s18 + $0x38] sm:$0xff] %v1382_v30 }
 0x419   : > { %1869 = shalt.err (!%p1866_p5)
}
 0x41a   : > { %s1870_s26 = scalar_lea.hbm %s3160_s25, 1024  ;;  %s1874_s20 = scalar_lea.hbm %s3213_s6, 2048 }
 0x41b   : > { %p1871_p11 = scmp.ne.s32.totalorder %s3160_s25, %s1870_s26  ;;  %p1875_p6 = scmp.lt.u32.totalorder %s3160_s25, %s3213_s6 }
 0x41c   : > { %p1876_p8 = scmp.lt.u32.totalorder %s1874_s20, %s1870_s26  ;;  %p1878_p3 = scmp.lt.u32.totalorder %s1870_s26, %s3160_s25 }
 0x41d   : > { %p1872_p12 = pnand %p1871_p11, %p3323_p9 }
 0x41e   : > { %p1877_p13 = por %p1876_p8, %p1875_p6 }
 0x41f   : > { %p1873_p4 = pneg %p1872_p12 }
 0x420   : > { %p1879_p10 = por %p1878_p3, %p1877_p13 }
 0x422   : > { %p1880_p1 = pnand %p1879_p10, %p1873_p4 }
 0x424   : > { %1883 = shalt.err (!%p1880_p1)
}
 0x425   : > { %s1946_s29 = smov 512   ;;  %s1947_s28 = smov 1024  }
 0x426   : > { %s1948_s13 = smov 32  }
 0x427   : > { %1686 = dma.vmem_to_hbm [thread:$0]  (%p3323_p9), %s3152_s30, 1024, %s3160_s25, %s1392_s14, %s1946_s29, %s1947_s28, %s1948_s13  }
 0x428 PF: > { %s1420_s19 = sand.u32 1, %s1914_s21   ;;  %p3324_p0 = scmp.ne.s32.totalorder %s3260_s10, 0 }
 0x429   : > { %p3325_p7 = scmp.ge.s32.totalorder %s1926_s24, 2  ;;  %s1421_s16 = scalar_lea.sflag [#allocation4], %s1420_s19 }
 0x42b   : > { %p1700_p2 = pnand %p3325_p7, %p3324_p0 }
 0x42d   : > { %1909 = dma.done.wait (!%p1700_p2), %s1421_s16, 1024  }
 0x42e   : > { %1911 = vsyncadd (!%p1700_p2), %s1421_s16, 4294966272  ;;  %s3326_s15 = sld [smem:[#allocation12_spill]]  ;;  %p20_p5 = scmp.ge.s32.totalorder %s2009_s27, 4  }
 0x42f   : > { %s3327_s21 = smov %s1918_s22  ;;  %s3328_s22 = smov %s1922_s23 }
 0x430   : > { %s3330_s24 = smov %s2009_s27  ;;  %22 = sbr.rel (!%p20_p5) target bundleno = 6 (0x6), region = 104 }
 0x434   : > { %s3329_s23 = smov %s3326_s15 }
 0x437   :  { %1426 = vsyncpa [#allocation3], 1 }
 0x438   :  { %1428 = vsyncpa [#allocation3 + $0x1], 1 }
 0x439   :  { %1429 = vsyncpa [#allocation6], 1 }
 0x43a   :  { %1430 = vsyncpa [#allocation4], 1 }
 0x43b   :  { %1432 = vsyncpa [#allocation4 + $0x1], 1 }

</bundles_post_ra>
